<compile_context>
chip_gen: v6e
topology: v6e:2x2x1
jax: 0.10.0
libtpu: 0.0.40
codegen_flags: <defaults>
</compile_context>

<pallas_src>
import jax
import jax.numpy as jnp
from jax.experimental import pallas as pl
from jax.experimental.pallas import tpu as pltpu


def count_fusion_kernel(x_ref, y_ref, wx_ref, wy_ref, bsum_ref, bdiff_ref, o_ref):
    # x_ref: (TM, dim_x) f32, wx_ref: (dim_x, N) f32, bsum/bdiff: (1, N) f32
    mx = jnp.dot(x_ref[...], wx_ref[...], preferred_element_type=jnp.float32)
    my = jnp.dot(y_ref[...], wy_ref[...], preferred_element_type=jnp.float32)
    s = mx + my + bsum_ref[...]     # == x1 + y1   (biases folded host-side)
    d = mx - my + bdiff_ref[...]    # == x1 - y1
    o_ref[...] = (jnp.maximum(s, 0.0) - d * d).astype(o_ref.dtype)


def _round_up(a, b):
    return (a + b - 1) // b * b


def _choose_tile_m(batch, requested, min_steps=4):
    """Largest multiple-of-8 tile <= requested giving >= min_steps grid steps
    (>= 2 per v7x TensorCore), floored at 128 rows (unless batch is smaller)
    to keep per-step overhead amortized and output stores large."""
    tm = max(8, min(requested, _round_up(batch, 8)))
    tm = (tm // 8) * 8
    while tm > 128 and pl.cdiv(batch, tm) < min_steps:
        tm = max(128, ((tm // 2) // 8) * 8)
    return tm


def count_fusion(x, y, wx_t, wy_t, bx, by, *, tile_m=512, out_dtype=jnp.float32):
    """x:(B,dim_x)  y:(B,dim_y)  wx_t:(dim_x,N)  wy_t:(dim_y,N)  bx,by:(N,)

    out_dtype=jnp.bfloat16 halves output HBM traffic (the dominant cost) when
    the downstream consumer tolerates bf16; default float32 matches PyTorch.
    """
    B, dim_x = x.shape
    By, dim_y = y.shape
    assert By == B, "x and y must share the batch dimension"
    Kx, N = wx_t.shape
    assert Kx == dim_x and wy_t.shape == (dim_y, N)

    # Fold biases: (x1+y1) uses bx+by, (x1-y1) uses bx-by.  Tiny host-side op.
    b_sum = (bx + by).reshape(1, N).astype(jnp.float32)
    b_diff = (bx - by).reshape(1, N).astype(jnp.float32)

    x = x.astype(jnp.float32)
    y = y.astype(jnp.float32)
    wx_t = wx_t.astype(jnp.float32)
    wy_t = wy_t.astype(jnp.float32)

    tm = _choose_tile_m(B, tile_m)
    grid = (pl.cdiv(B, tm),)          # ragged final block handled by masking

    out_itemsize = jnp.dtype(out_dtype).itemsize
    flops = 2 * B * N * (dim_x + dim_y)
    bytes_accessed = (
        x.size * 4 + y.size * 4 +              # streamed f32 inputs
        wx_t.size * 4 + wy_t.size * 4 +        # resident f32 weights (DMA'd once)
        b_sum.size * 4 + b_diff.size * 4 +     # folded biases
        B * N * out_itemsize                   # output (dominant term)
    )

    return pl.pallas_call(
        count_fusion_kernel,
        out_shape=jax.ShapeDtypeStruct((B, N), out_dtype),
        grid_spec=pltpu.PrefetchScalarGridSpec(
            num_scalar_prefetch=0,
            grid=grid,
            in_specs=[
                pl.BlockSpec((tm, dim_x), lambda i: (i, 0)),   # x tile (streamed)
                pl.BlockSpec((tm, dim_y), lambda i: (i, 0)),   # y tile (streamed)
                pl.BlockSpec((dim_x, N), lambda i: (0, 0)),    # Wx^T (resident)
                pl.BlockSpec((dim_y, N), lambda i: (0, 0)),    # Wy^T (resident)
                pl.BlockSpec((1, N), lambda i: (0, 0)),        # bx+by (resident)
                pl.BlockSpec((1, N), lambda i: (0, 0)),        # bx-by (resident)
            ],
            out_specs=pl.BlockSpec((tm, N), lambda i: (i, 0)),
        ),
        compiler_params=pltpu.CompilerParams(
            dimension_semantics=("parallel",),
        ),
        cost_estimate=pl.CostEstimate(
            flops=flops, transcendentals=0, bytes_accessed=bytes_accessed),
    )(x, y, wx_t, wy_t, b_sum, b_diff)


def count_fusion_ref(x, y, wx_t, wy_t, bx, by):
    x1 = jnp.dot(x, wx_t, precision=jax.lax.Precision.HIGHEST) + bx[None, :]
    y1 = jnp.dot(y, wy_t, precision=jax.lax.Precision.HIGHEST) + by[None, :]
    item1 = jnp.maximum(x1 + y1, 0.0)
    item2 = (x1 - y1) ** 2
    return item1 - item2


if __name__ == "__main__":
    # Shapes consistent with the module: dim_x=32, dim_y=64 and the PyTorch
    # default output_dim=512.  B=512 -> tm=128, grid=(4,): >= 2 steps per v7x
    # TensorCore, so the auto-pipeline has something to overlap.
    B, dim_x, dim_y, output_dim = 512, 32, 64, 512

    key = jax.random.PRNGKey(0)
    kx, ky, kwx, kwy, kbx, kby = jax.random.split(key, 6)

    x = jax.random.normal(kx, (B, dim_x), dtype=jnp.float32)
    y = jax.random.normal(ky, (B, dim_y), dtype=jnp.float32)

    # nn.Linear-style params: weight (out, in), bias (out,).  Stored
    # pre-transposed as (in, out) for the kernel's [M,K]x[K,N] matmul.
    wx = jax.random.normal(kwx, (output_dim, dim_x), dtype=jnp.float32) * 0.05
    wy = jax.random.normal(kwy, (output_dim, dim_y), dtype=jnp.float32) * 0.05
    bx = jax.random.normal(kbx, (output_dim,), dtype=jnp.float32) * 0.05
    by = jax.random.normal(kby, (output_dim,), dtype=jnp.float32) * 0.05

    wx_t = wx.T   # (dim_x, output_dim)
    wy_t = wy.T   # (dim_y, output_dim)

    ref = count_fusion_ref(x, y, wx_t, wy_t, bx, by)

    # 1) Default f32 output path.
    out = jax.block_until_ready(count_fusion(x, y, wx_t, wy_t, bx, by))
    assert out.shape == (B, output_dim) and out.dtype == jnp.float32
    assert jnp.allclose(out, ref, atol=2e-2, rtol=2e-2), "f32 mismatch vs reference"

    # 2) bf16 output path (halves the dominant HBM output traffic).
    out_bf = jax.block_until_ready(
        count_fusion(x, y, wx_t, wy_t, bx, by, out_dtype=jnp.bfloat16))
    assert out_bf.dtype == jnp.bfloat16
    assert jnp.allclose(out_bf.astype(jnp.float32), ref, atol=3e-2, rtol=3e-2), \
        "bf16 mismatch vs reference"

    # 3) Ragged batch: exercises the masked partial final block (no host pad).
    Br = 300
    out_r = jax.block_until_ready(
        count_fusion(x[:Br], y[:Br], wx_t, wy_t, bx, by))
    assert out_r.shape == (Br, output_dim)
    assert jnp.allclose(out_r, ref[:Br], atol=2e-2, rtol=2e-2), \
        "ragged-batch mismatch vs reference"

    print("KERNEL_OK")
</pallas_src>

<mosaic_0001>
module attributes {stable_mosaic.version = 11 : i64} {
  func.func @count_fusion_kernel(%arg0: i32, %arg1: memref<128x32xf32, #tpu.memory_space<vmem>>, %arg2: memref<128x64xf32, #tpu.memory_space<vmem>>, %arg3: memref<32x512xf32, #tpu.memory_space<vmem>>, %arg4: memref<64x512xf32, #tpu.memory_space<vmem>>, %arg5: memref<1x512xf32, #tpu.memory_space<vmem>>, %arg6: memref<1x512xf32, #tpu.memory_space<vmem>>, %arg7: memref<128x512xf32, #tpu.memory_space<vmem>>) attributes {dimension_semantics = [#tpu.dimension_semantics<parallel>], iteration_bounds = array<i64: 4>, scalar_prefetch = 0 : i64, scratch_operands = 0 : i64, tpu.core_type = #tpu.core_type<tc>, window_params = [{transform_indices = @transform_0, window_bounds = array<i64: 128, 32>}, {transform_indices = @transform_1, window_bounds = array<i64: 128, 64>}, {pipeline_mode = #tpu.pipeline_mode<synchronous>, transform_indices = @transform_2, window_bounds = array<i64: 32, 512>}, {pipeline_mode = #tpu.pipeline_mode<synchronous>, transform_indices = @transform_3, window_bounds = array<i64: 64, 512>}, {pipeline_mode = #tpu.pipeline_mode<synchronous>, transform_indices = @transform_4, window_bounds = array<i64: 1, 512>}, {pipeline_mode = #tpu.pipeline_mode<synchronous>, transform_indices = @transform_5, window_bounds = array<i64: 1, 512>}, {transform_indices = @transform_6, window_bounds = array<i64: 128, 512>}]} {
    %c0 = arith.constant 0 : index
    %c0_0 = arith.constant 0 : index
    %0 = vector.load %arg1[%c0, %c0_0] : memref<128x32xf32, #tpu.memory_space<vmem>>, vector<128x32xf32>
    %c0_1 = arith.constant 0 : index
    %c0_2 = arith.constant 0 : index
    %1 = vector.load %arg3[%c0_1, %c0_2] : memref<32x512xf32, #tpu.memory_space<vmem>>, vector<32x512xf32>
    %cst = arith.constant dense<0.000000e+00> : vector<128x512xf32>
    %2 = tpu.matmul %0, %1, %cst {dimension_numbers = #tpu.dot_dimension_numbers<[1], [0], [0], [1], [0, 0, 1, 1], [], []>} : vector<128x32xf32>, vector<32x512xf32>, vector<128x512xf32> -> vector<128x512xf32>
    %c0_3 = arith.constant 0 : index
    %c0_4 = arith.constant 0 : index
    %3 = vector.load %arg2[%c0_3, %c0_4] : memref<128x64xf32, #tpu.memory_space<vmem>>, vector<128x64xf32>
    %c0_5 = arith.constant 0 : index
    %c0_6 = arith.constant 0 : index
    %4 = vector.load %arg4[%c0_5, %c0_6] : memref<64x512xf32, #tpu.memory_space<vmem>>, vector<64x512xf32>
    %cst_7 = arith.constant dense<0.000000e+00> : vector<128x512xf32>
    %5 = tpu.matmul %3, %4, %cst_7 {dimension_numbers = #tpu.dot_dimension_numbers<[1], [0], [0], [1], [0, 0, 1, 1], [], []>} : vector<128x64xf32>, vector<64x512xf32>, vector<128x512xf32> -> vector<128x512xf32>
    %6 = arith.addf %2, %5 : vector<128x512xf32>
    %c0_8 = arith.constant 0 : index
    %c0_9 = arith.constant 0 : index
    %7 = vector.load %arg5[%c0_8, %c0_9] : memref<1x512xf32, #tpu.memory_space<vmem>>, vector<1x512xf32>
    %8 = vector.broadcast %7 : vector<1x512xf32> to vector<128x512xf32>
    %9 = arith.addf %6, %8 : vector<128x512xf32>
    %10 = arith.subf %2, %5 : vector<128x512xf32>
    %c0_10 = arith.constant 0 : index
    %c0_11 = arith.constant 0 : index
    %11 = vector.load %arg6[%c0_10, %c0_11] : memref<1x512xf32, #tpu.memory_space<vmem>>, vector<1x512xf32>
    %12 = vector.broadcast %11 : vector<1x512xf32> to vector<128x512xf32>
    %13 = arith.addf %10, %12 : vector<128x512xf32>
    %cst_12 = arith.constant 0.000000e+00 : f32
    %14 = vector.broadcast %cst_12 : f32 to vector<128x512xf32>
    %15 = arith.maximumf %9, %14 : vector<128x512xf32>
    %16 = arith.mulf %13, %13 : vector<128x512xf32>
    %17 = arith.subf %15, %16 : vector<128x512xf32>
    %c0_13 = arith.constant 0 : index
    %c0_14 = arith.constant 0 : index
    %18 = vector.load %arg7[%c0_13, %c0_14] : memref<128x512xf32, #tpu.memory_space<vmem>>, vector<128x512xf32>
    tpu.vector_store %arg7[%c0_13, %c0_14], %17 {strides = array<i32>} : memref<128x512xf32, #tpu.memory_space<vmem>>, vector<128x512xf32>,
    return
  }
  func.func @transform_0(%arg0: i32) -> (i32, i32) {
    %c0_i32 = arith.constant 0 : i32
    %c0_i32_0 = arith.constant 0 : i32
    return %arg0, %c0_i32 : i32, i32
  }
  func.func @transform_1(%arg0: i32) -> (i32, i32) {
    %c0_i32 = arith.constant 0 : i32
    %c0_i32_0 = arith.constant 0 : i32
    return %arg0, %c0_i32 : i32, i32
  }
  func.func @transform_2(%arg0: i32) -> (i32, i32) {
    %c0_i32 = arith.constant 0 : i32
    %c0_i32_0 = arith.constant 0 : i32
    %c0_i32_1 = arith.constant 0 : i32
    return %c0_i32, %c0_i32_0 : i32, i32
  }
  func.func @transform_3(%arg0: i32) -> (i32, i32) {
    %c0_i32 = arith.constant 0 : i32
    %c0_i32_0 = arith.constant 0 : i32
    %c0_i32_1 = arith.constant 0 : i32
    return %c0_i32, %c0_i32_0 : i32, i32
  }
  func.func @transform_4(%arg0: i32) -> (i32, i32) {
    %c0_i32 = arith.constant 0 : i32
    %c0_i32_0 = arith.constant 0 : i32
    %c0_i32_1 = arith.constant 0 : i32
    return %c0_i32, %c0_i32_0 : i32, i32
  }
  func.func @transform_5(%arg0: i32) -> (i32, i32) {
    %c0_i32 = arith.constant 0 : i32
    %c0_i32_0 = arith.constant 0 : i32
    %c0_i32_1 = arith.constant 0 : i32
    return %c0_i32, %c0_i32_0 : i32, i32
  }
  func.func @transform_6(%arg0: i32) -> (i32, i32) {
    %c0_i32 = arith.constant 0 : i32
    %c0_i32_0 = arith.constant 0 : i32
    return %arg0, %c0_i32 : i32, i32
  }
}

</mosaic_0001>

<bundles_post_ra>
// kernel: tpu_custom_call.1
= control target key start
LH: loop header
LB: loop body
LE: loop exit
PB: predicated region body
PF: predicated region fallthrough
CT: control target
= control target key end

     0   :  { %11 = vsyncpa [#allocation3], 0  ;;  %s2949_s0 = inlined_call_operand.vmem [shape: f32[512,32], index: 0, kind: input, shape index: {}]   ;;  %s2950_s1 = inlined_call_operand.vmem [shape: f32[512,64], index: 1, kind: input, shape index: {}]   ;;  %s2951_s2 = inlined_call_operand.vmem [shape: f32[32,512], index: 2, kind: input, shape index: {}]   ;;  %s2952_s3 = inlined_call_operand.vmem [shape: f32[64,512], index: 3, kind: input, shape index: {}]   ;;  %s2953_s4 = inlined_call_operand.vmem [shape: f32[1,512], index: 4, kind: input, shape index: {}]   ;;  %s2954_s5 = inlined_call_operand.vmem [shape: f32[1,512], index: 5, kind: input, shape index: {}]   ;;  %s2955_s6 = inlined_call_operand.hbm [shape: f32[512,512], index: 6, kind: output, shape index: {}]  }
   0x1   :  { %13 = vsyncpa [#allocation3 + $0x1], 0  ;;  %s1966_s21 = smov 0   ;;  %s1968_s22 = smov 0  }
   0x2   :  { %s1970_s23 = smov 0   ;;  %s1972_s24 = smov 0  }
   0x3 LB: > { %s1987_s25 = sadd.s32 4294967295, %s1925_s24   ;;  %s1742_s26 = sadd.s32 4294967294, %s1925_s24   ;;  %s1925_s24 = sphi %s1972_s24, %s3048_s24   ;;  %s1921_s23 = sphi %s1970_s23, %s3047_s23   ;;  %s1917_s22 = sphi %s1968_s22, %s3046_s22   ;;  %s1913_s21 = sphi %s1966_s21, %s3045_s21  }
   0x4   : > { %s1991_s27 = sadd.s32 1, %s1925_s24   ;;  %s162_s28 = sadd.s32 1, %s1921_s23 }
   0x5   : > { %s159_s29 = ssub.s32 %s1925_s24, %s1991_s27  ;;  %p172_p0 = scmp.ne.s32.totalorder %s1921_s23, %s1917_s22 }
   0x6   : > { %p160_p1 = scmp.eq.s32.totalorder %s159_s29, 0  ;;  %p173_p2 = scmp.eq.s32.totalorder %s1987_s25, 3 }
   0x7   : > { %p178_p3 = scmp.ne.s32.totalorder %s1917_s22, %s1913_s21  ;;  %p179_p4 = scmp.eq.s32.totalorder %s1742_s26, 3 }
   0x8   : > { %s2002_s30 = scalar_select %p160_p1, %s1921_s23, %s162_s28  }
   0x9   : > { %p2004_p5 = por %p173_p2, %p172_p0  ;;  %p2008_p6 = por %p179_p4, %p178_p3 }
   0xa   : > { %p1745_p7 = scmp.ge.s32.totalorder %s1925_s24, 1  ;;  %p227_p8 = scmp.lt.s32.totalorder %s1925_s24, 5 }
   0xc   : > { %p228_p9 = pnand %p1745_p7, %p227_p8 }
   0xe   : > { %231 = sbr.rel (%p228_p9) target bundleno = 418 (0x1a2), region = 44 }
  0x13   : > { %v304_v0 = vld [vmem:[%s2951_s2 + $0x68] sm:$0xff]  ;;  %v306_v1 = vld [vmem:[%s2951_s2 + $0x78] sm:$0xff]  ;;  %v303_v2 = vld [vmem:[%s2951_s2 + $0x60] sm:$0xff]  ;;  %s1747_s15 = sshll.u32 %s1987_s25, 4  ;;  %vm307_vm0 = vcmask 261120   ;;  %v1927_v17 = vmov 0.0  }
  0x14   : > { %380 = vmatprep.subr.mxu0 %v304_v0  ;;  %541 = vmatprep.subr.mxu1 %v306_v1  ;;  %v305_v3 = vld [vmem:[%s2951_s2 + $0x70] sm:$0xff]  ;;  %v300_v4 = vld [vmem:[%s2951_s2 + $0x48] sm:$0xff]  ;;  %v302_v5 = vld [vmem:[%s2951_s2 + $0x58] sm:$0xff]  ;;  %p263_p10 = scmp.lt.s32.totalorder %s1747_s15, 63  ;;  %vm726_vm1 = vcmask 523264   ;;  %s259_s12 = sand.u32 1, %s1917_s22  }
  0x15   : > { %381 = vmatpush1.msra.mxu0 %v303_v2  ;;  %542 = vmatpush1.msra.mxu1 %v305_v3  ;;  %v299_v6 = vld [vmem:[%s2951_s2 + $0x40] sm:$0xff]  ;;  %v301_v7 = vld [vmem:[%s2951_s2 + $0x50] sm:$0xff]  ;;  %v296_v8 = vld [vmem:[%s2951_s2 + $0x28] sm:$0xff]  ;;  %s2493_s13 = sshll.u32 %s259_s12, 9  ;;  %s1822_s16 = sshll.u32 %s1987_s25, 13 }
  0x16   : > { %382 = vmatprep.subr.mxu0 %v300_v4  ;;  %543 = vmatprep.subr.mxu1 %v302_v5  ;;  %v298_v9 = vld [vmem:[%s2951_s2 + $0x38] sm:$0xff]  ;;  %v295_v10 = vld [vmem:[%s2951_s2 + $0x20] sm:$0xff]  ;;  %v297_v11 = vld [vmem:[%s2951_s2 + $0x30] sm:$0xff]  ;;  %s3050_s15 = smov (!%p263_p10, %s1747_s15), 63  ;;  %s2510_s14 = scalar_lea.vmem [#allocation2], %s2493_s13 }
  0x17   : > { %383 = vmatpush1.msra.mxu0 %v299_v6  ;;  %544 = vmatpush1.msra.mxu1 %v301_v7  ;;  %v292_v12 = vld [vmem:[%s2951_s2 + $0x8] sm:$0xff]  ;;  %v294_v13 = vld [vmem:[%s2951_s2 + $0x18] sm:$0xff]  ;;  %v291_v14 = vld [vmem:[%s2951_s2] sm:$0xff]  ;;  %s1748_s11 = sshll.u32 %s3050_s15, 3  ;;  %s1668_s18 = sshll.u32 %s2510_s14, 4  ;;  %s2903_s18 = int_to_ptr.vmem [resolvable:$true] %s1668_s18 }
  0x18   : > { %384 = vmatprep.subr.mxu0 %v296_v8  ;;  %545 = vmatprep.subr.mxu1 %v298_v9  ;;  %v293_v15 = vld [vmem:[%s2951_s2 + $0x10] sm:$0xff]  ;;  %s2071_s17 = scalar_lea.vmem %s2949_s0, %s1748_s11  ;;  %v723_v18 = vld [vmem:[%s2952_s3 + $0xe8] sm:$0xff]  ;;  %v725_v19 = vld [vmem:[%s2952_s3 + $0xf8] sm:$0xff]  ;;  %s2252_s9 = scalar_lea.vmem %s2950_s1, %s1748_s11 }
  0x19   : > { %385 = vmatpush1.msra.mxu0 %v295_v10  ;;  %546 = vmatpush1.msra.mxu1 %v297_v11  ;;  %v275_v16 = vld [vmem:[%s2071_s17] sm:$0xff]  ;;  %v724_v21 = vld [vmem:[%s2952_s3 + $0xf0] sm:$0xff]  ;;  %v276_v22 = vld [vmem:[%s2071_s17 + $0x8] sm:$0xff]  ;;  %s2901_s26 = scalar_lea.hbm %s2955_s6, %s1822_s16  ;;  %s2909_s25 = scalar_lea.sflag [#allocation3], %s259_s12 }
  0x1a   : > { %386 = vmatprep.subr.mxu0 %v292_v12  ;;  %547 = vmatprep.subr.mxu1 %v294_v13  ;;  %v722_v20 = vld [vmem:[%s2952_s3 + $0xe0] sm:$0xff]  ;;  %v719_v23 = vld [vmem:[%s2952_s3 + $0xc8] sm:$0xff]  ;;  %v721_v24 = vld [vmem:[%s2952_s3 + $0xd8] sm:$0xff]  ;;  %s1865_s28 = scalar_lea.vmem %s2903_s18, 8192  ;;  %s1928_s29 = smov [#allocation2]  }
  0x1b   : > { %387 = vmatpush1.msra.mxu0 %v291_v14  ;;  %420 = vmatprep.mubr.f32.mxu0 %v1927_v17  ;;  %v718_v25 = vld [vmem:[%s2952_s3 + $0xc0] sm:$0xff]  ;;  %v720_v26 = vld [vmem:[%s2952_s3 + $0xd0] sm:$0xff]  ;;  %v715_v28 = vld [vmem:[%s2952_s3 + $0xa8] sm:$0xff]  ;;  %p1866_p11 = scmp.ne.s32.totalorder %s2903_s18, %s1865_s28 }
  0x1c   : > { %548 = vmatpush1.msra.mxu1 %v293_v15  ;;  %581 = vmatprep.mubr.f32.mxu1 %v1927_v17  ;;  %v277_v27 = vld [vmem:[%s2071_s17 + $0x10] sm:$0xff]  ;;  %v717_v29 = vld [vmem:[%s2952_s3 + $0xb8] sm:$0xff]  ;;  %v714_v30 = vld [vmem:[%s2952_s3 + $0xa0] sm:$0xff] }
  0x1d   : > { %1751 = vmatmul.mubr.msk.f32.vlgmr.msra.gmra.mxu0 %vm307_vm0, %v275_v16  ;;  %1767 = vmatmul.mubr.msk.f32.vlgmr.msra.gmra.mxu1 %vm307_vm0, %v275_v16  ;;  %v716_v31 = vld [vmem:[%s2952_s3 + $0xb0] sm:$0xff]  ;;  %v278_v32 = vld [vmem:[%s2071_s17 + $0x18] sm:$0xff]  ;;  %v711_v33 = vld [vmem:[%s2952_s3 + $0x88] sm:$0xff]  ;;  %p1867_p12 = pnand %p1866_p11, %p2004_p5 }
  0x1e   : > { %791 = vmatprep.subr.mxu0 %v723_v18  ;;  %952 = vmatprep.subr.mxu1 %v725_v19  ;;  %v713_v34 = vld [vmem:[%s2952_s3 + $0x98] sm:$0xff]  ;;  %v710_v35 = vld [vmem:[%s2952_s3 + $0x80] sm:$0xff]  ;;  %v712_v36 = vld [vmem:[%s2952_s3 + $0x90] sm:$0xff] }
  0x1f   : > { %792 = vmatpush1.msra.mxu0 %v722_v20  ;;  %953 = vmatpush1.msra.mxu1 %v724_v21  ;;  %v279_v37 = vld [vmem:[%s2071_s17 + $0x20] sm:$0xff]  ;;  %v707_v38 = vld [vmem:[%s2952_s3 + $0x68] sm:$0xff]  ;;  %v709_v39 = vld [vmem:[%s2952_s3 + $0x78] sm:$0xff]  ;;  %p1868_p13 = pneg %p1867_p12 }
  0x20   : > { %426 = vmatprep.mubr.f32.mxu0 %v1927_v17  ;;  %587 = vmatprep.mubr.f32.mxu1 %v1927_v17  ;;  %v706_v40 = vld [vmem:[%s2952_s3 + $0x60] sm:$0xff]  ;;  %v708_v41 = vld [vmem:[%s2952_s3 + $0x70] sm:$0xff]  ;;  %v280_v42 = vld [vmem:[%s2071_s17 + $0x28] sm:$0xff] }
  0x21   : > { %1752 = vmatmul.mubr.msk.f32.gmra.mxu0 %vm307_vm0, %v276_v22  ;;  %1768 = vmatmul.mubr.msk.f32.gmra.mxu1 %vm307_vm0, %v276_v22  ;;  %v703_v43 = vld [vmem:[%s2952_s3 + $0x48] sm:$0xff]  ;;  %v705_v44 = vld [vmem:[%s2952_s3 + $0x58] sm:$0xff]  ;;  %v702_v45 = vld [vmem:[%s2952_s3 + $0x40] sm:$0xff] }
  0x22   : > { %432 = vmatprep.mubr.f32.mxu0 %v1927_v17  ;;  %593 = vmatprep.mubr.f32.mxu1 %v1927_v17  ;;  %v704_v46 = vld [vmem:[%s2952_s3 + $0x50] sm:$0xff]  ;;  %v699_v48 = vld [vmem:[%s2952_s3 + $0x28] sm:$0xff]  ;;  %v701_v49 = vld [vmem:[%s2952_s3 + $0x38] sm:$0xff] }
  0x23   : > { %793 = vmatprep.subr.mxu0 %v719_v23  ;;  %954 = vmatprep.subr.mxu1 %v721_v24  ;;  %v281_v47 = vld [vmem:[%s2071_s17 + $0x30] sm:$0xff]  ;;  %v698_v50 = vld [vmem:[%s2952_s3 + $0x20] sm:$0xff]  ;;  %v282_v52 = vld [vmem:[%s2071_s17 + $0x38] sm:$0xff] }
  0x24   : > { %794 = vmatpush1.msra.mxu0 %v718_v25  ;;  %955 = vmatpush1.msra.mxu1 %v720_v26  ;;  %v700_v51 = vld [vmem:[%s2952_s3 + $0x30] sm:$0xff]  ;;  %v695_v53 = vld [vmem:[%s2952_s3 + $0x8] sm:$0xff]  ;;  %v697_v54 = vld [vmem:[%s2952_s3 + $0x18] sm:$0xff] }
  0x25   : > { %1753 = vmatmul.mubr.msk.f32.gmra.mxu0 %vm307_vm0, %v277_v27  ;;  %1769 = vmatmul.mubr.msk.f32.gmra.mxu1 %vm307_vm0, %v277_v27  ;;  %v694_v55 = vld [vmem:[%s2952_s3] sm:$0xff]  ;;  %v696_v56 = vld [vmem:[%s2952_s3 + $0x10] sm:$0xff]  ;;  %v284_v58 = vld [vmem:[%s2071_s17 + $0x48] sm:$0xff] }
  0x26   : > { %438 = vmatprep.mubr.f32.mxu0 %v1927_v17  ;;  %599 = vmatprep.mubr.f32.mxu1 %v1927_v17  ;;  %v283_v57 = vld [vmem:[%s2071_s17 + $0x40] sm:$0xff]  ;;  %v285_v59 = vld [vmem:[%s2071_s17 + $0x50] sm:$0xff]  ;;  %v286_v60 = vld [vmem:[%s2071_s17 + $0x58] sm:$0xff] }
  0x27   : > { %795 = vmatprep.subr.mxu0 %v715_v28  ;;  %956 = vmatprep.subr.mxu1 %v717_v29  ;;  %v287_v61 = vld [vmem:[%s2071_s17 + $0x60] sm:$0xff]  ;;  %v288_v62 = vld [vmem:[%s2071_s17 + $0x68] sm:$0xff]  ;;  %v289_v63 = vld [vmem:[%s2071_s17 + $0x70] sm:$0xff] }
  0x28   : > { %796 = vmatpush1.msra.mxu0 %v714_v30  ;;  %957 = vmatpush1.msra.mxu1 %v716_v31  ;;  %v290_v0 = vld [vmem:[%s2071_s17 + $0x78] sm:$0xff]  ;;  %v678_v1 = vld [vmem:[%s2252_s9] sm:$0xff]  ;;  %v679_v2 = vld [vmem:[%s2252_s9 + $0x8] sm:$0xff] }
  0x29   : > { %1754 = vmatmul.mubr.msk.f32.gmra.mxu0 %vm307_vm0, %v278_v32  ;;  %1770 = vmatmul.mubr.msk.f32.gmra.mxu1 %vm307_vm0, %v278_v32  ;;  %v680_v3 = vld [vmem:[%s2252_s9 + $0x10] sm:$0xff]  ;;  %v681_v4 = vld [vmem:[%s2252_s9 + $0x18] sm:$0xff]  ;;  %v682_v5 = vld [vmem:[%s2252_s9 + $0x20] sm:$0xff] }
  0x2a   : > { %444 = vmatprep.mubr.f32.mxu0 %v1927_v17  ;;  %605 = vmatprep.mubr.f32.mxu1 %v1927_v17  ;;  %v683_v6 = vld [vmem:[%s2252_s9 + $0x28] sm:$0xff]  ;;  %v684_v7 = vld [vmem:[%s2252_s9 + $0x30] sm:$0xff]  ;;  %v685_v8 = vld [vmem:[%s2252_s9 + $0x38] sm:$0xff] }
  0x2b   : > { %797 = vmatprep.subr.mxu0 %v711_v33  ;;  %958 = vmatprep.subr.mxu1 %v713_v34  ;;  %v686_v9 = vld [vmem:[%s2252_s9 + $0x40] sm:$0xff]  ;;  %v687_v10 = vld [vmem:[%s2252_s9 + $0x48] sm:$0xff]  ;;  %v688_v11 = vld [vmem:[%s2252_s9 + $0x50] sm:$0xff] }
  0x2c   : > { %798 = vmatpush1.msra.mxu0 %v710_v35  ;;  %959 = vmatpush1.msra.mxu1 %v712_v36  ;;  %v689_v12 = vld [vmem:[%s2252_s9 + $0x58] sm:$0xff]  ;;  %v690_v13 = vld [vmem:[%s2252_s9 + $0x60] sm:$0xff]  ;;  %v691_v14 = vld [vmem:[%s2252_s9 + $0x68] sm:$0xff] }
  0x2d   : > { %1755 = vmatmul.mubr.msk.f32.gmra.mxu0 %vm307_vm0, %v279_v37  ;;  %1771 = vmatmul.mubr.msk.f32.gmra.mxu1 %vm307_vm0, %v279_v37  ;;  %v692_v15 = vld [vmem:[%s2252_s9 + $0x70] sm:$0xff]  ;;  %v693_v16 = vld [vmem:[%s2252_s9 + $0x78] sm:$0xff]  ;;  %s1869_s9 = sshll.u32 %s1928_s29, 4  ;;  %s1870_s9 = int_to_ptr.vmem [resolvable:$false] %s1869_s9 }
  0x2e   : > { %450 = vmatprep.mubr.f32.mxu0 %v1927_v17  ;;  %611 = vmatprep.mubr.f32.mxu1 %v1927_v17  ;;  %s1871_s15 = scalar_lea.vmem %s1870_s9, 16384  ;;  %p1872_p0 = scmp.lt.s32.totalorder %s2903_s18, %s1870_s9 }
  0x2f   : > { %799 = vmatprep.subr.mxu0 %v707_v38  ;;  %960 = vmatprep.subr.mxu1 %v709_v39  ;;  %p1873_p1 = scmp.lt.s32.totalorder %s1871_s15, %s1865_s28 }
  0x30   : > { %800 = vmatpush1.msra.mxu0 %v706_v40  ;;  %961 = vmatpush1.msra.mxu1 %v708_v41 }
  0x31   : > { %1756 = vmatmul.mubr.msk.f32.gmra.mxu0 %vm307_vm0, %v280_v42  ;;  %1772 = vmatmul.mubr.msk.f32.gmra.mxu1 %vm307_vm0, %v280_v42  ;;  %p1874_p2 = por %p1873_p1, %p1872_p0 }
  0x32   : > { %456 = vmatprep.mubr.f32.mxu0 %v1927_v17  ;;  %617 = vmatprep.mubr.f32.mxu1 %v1927_v17 }
  0x33   : > { %801 = vmatprep.subr.mxu0 %v703_v43  ;;  %962 = vmatprep.subr.mxu1 %v705_v44  ;;  %p1875_p3 = pnand %p1874_p2, %p1868_p13 }
  0x34   : > { %802 = vmatpush1.msra.mxu0 %v702_v45  ;;  %963 = vmatpush1.msra.mxu1 %v704_v46 }
  0x35   : > { %1757 = vmatmul.mubr.msk.f32.gmra.mxu0 %vm307_vm0, %v281_v47  ;;  %1773 = vmatmul.mubr.msk.f32.gmra.mxu1 %vm307_vm0, %v281_v47 }
  0x36   : > { %462 = vmatprep.mubr.f32.mxu0 %v1927_v17  ;;  %623 = vmatprep.mubr.f32.mxu1 %v1927_v17 }
  0x37   : > { %803 = vmatprep.subr.mxu0 %v699_v48  ;;  %964 = vmatprep.subr.mxu1 %v701_v49 }
  0x38   : > { %804 = vmatpush1.msra.mxu0 %v698_v50  ;;  %965 = vmatpush1.msra.mxu1 %v700_v51 }
  0x39   : > { %1758 = vmatmul.mubr.msk.f32.gmra.mxu0 %vm307_vm0, %v282_v52  ;;  %1774 = vmatmul.mubr.msk.f32.gmra.mxu1 %vm307_vm0, %v282_v52 }
  0x3a   : > { %468 = vmatprep.mubr.f32.mxu0 %v1927_v17  ;;  %629 = vmatprep.mubr.f32.mxu1 %v1927_v17 }
  0x3b   : > { %805 = vmatprep.subr.mxu0 %v695_v53  ;;  %966 = vmatprep.subr.mxu1 %v697_v54 }
  0x3c   : > { %806 = vmatpush1.msra.mxu0 %v694_v55  ;;  %967 = vmatpush1.msra.mxu1 %v696_v56 }
  0x3d   : > { %1759 = vmatmul.mubr.msk.f32.gmra.mxu0 %vm307_vm0, %v283_v57  ;;  %1775 = vmatmul.mubr.msk.f32.gmra.mxu1 %vm307_vm0, %v283_v57 }
  0x3e   : > { %474 = vmatprep.mubr.f32.mxu0 %v1927_v17  ;;  %635 = vmatprep.mubr.f32.mxu1 %v1927_v17 }
  0x41   : > { %1760 = vmatmul.mubr.msk.f32.gmra.mxu0 %vm307_vm0, %v284_v58  ;;  %1776 = vmatmul.mubr.msk.f32.gmra.mxu1 %vm307_vm0, %v284_v58 }
  0x42   : > { %480 = vmatprep.mubr.f32.mxu0 %v1927_v17  ;;  %641 = vmatprep.mubr.f32.mxu1 %v1927_v17 }
  0x45   : > { %1761 = vmatmul.mubr.msk.f32.gmra.mxu0 %vm307_vm0, %v285_v59  ;;  %1777 = vmatmul.mubr.msk.f32.gmra.mxu1 %vm307_vm0, %v285_v59 }
  0x46   : > { %486 = vmatprep.mubr.f32.mxu0 %v1927_v17  ;;  %647 = vmatprep.mubr.f32.mxu1 %v1927_v17 }
  0x49   : > { %1762 = vmatmul.mubr.msk.f32.gmra.mxu0 %vm307_vm0, %v286_v60  ;;  %1778 = vmatmul.mubr.msk.f32.gmra.mxu1 %vm307_vm0, %v286_v60 }
  0x4a   : > { %492 = vmatprep.mubr.f32.mxu0 %v1927_v17  ;;  %653 = vmatprep.mubr.f32.mxu1 %v1927_v17 }
  0x4d   : > { %1763 = vmatmul.mubr.msk.f32.gmra.mxu0 %vm307_vm0, %v287_v61  ;;  %1779 = vmatmul.mubr.msk.f32.gmra.mxu1 %vm307_vm0, %v287_v61 }
  0x4e   : > { %498 = vmatprep.mubr.f32.mxu0 %v1927_v17  ;;  %659 = vmatprep.mubr.f32.mxu1 %v1927_v17 }
  0x51   : > { %1764 = vmatmul.mubr.msk.f32.gmra.mxu0 %vm307_vm0, %v288_v62  ;;  %1780 = vmatmul.mubr.msk.f32.gmra.mxu1 %vm307_vm0, %v288_v62 }
  0x52   : > { %504 = vmatprep.mubr.f32.mxu0 %v1927_v17  ;;  %665 = vmatprep.mubr.f32.mxu1 %v1927_v17 }
  0x55   : > { %1765 = vmatmul.mubr.msk.f32.gmra.mxu0 %vm307_vm0, %v289_v63  ;;  %1781 = vmatmul.mubr.msk.f32.gmra.mxu1 %vm307_vm0, %v289_v63 }
  0x56   : > { %510 = vmatprep.mubr.f32.mxu0 %v1927_v17  ;;  %671 = vmatprep.mubr.f32.mxu1 %v1927_v17 }
  0x59   : > { %1766 = vmatmul.mubr.msk.f32.gmra.mxu0 %vm307_vm0, %v290_v0  ;;  %1782 = vmatmul.mubr.msk.f32.gmra.mxu1 %vm307_vm0, %v290_v0 }
  0x5a   : > { %839 = vmatprep.mubr.f32.mxu0 %v1927_v17  ;;  %1000 = vmatprep.mubr.f32.mxu1 %v1927_v17 }
  0x5d   : > { %1783 = vmatmul.mubr.msk.f32.vlgmr.msra.gmra.mxu0 %vm726_vm1, %v678_v1  ;;  %1799 = vmatmul.mubr.msk.f32.vlgmr.msra.gmra.mxu1 %vm726_vm1, %v678_v1 }
  0x5e   : > { %845 = vmatprep.mubr.f32.mxu0 %v1927_v17  ;;  %1006 = vmatprep.mubr.f32.mxu1 %v1927_v17 }
  0x61   : > { %1784 = vmatmul.mubr.msk.f32.gmra.mxu0 %vm726_vm1, %v679_v2  ;;  %1800 = vmatmul.mubr.msk.f32.gmra.mxu1 %vm726_vm1, %v679_v2 }
  0x62   : > { %851 = vmatprep.mubr.f32.mxu0 %v1927_v17  ;;  %1012 = vmatprep.mubr.f32.mxu1 %v1927_v17 }
  0x65   : > { %1785 = vmatmul.mubr.msk.f32.gmra.mxu0 %vm726_vm1, %v680_v3  ;;  %1801 = vmatmul.mubr.msk.f32.gmra.mxu1 %vm726_vm1, %v680_v3 }
  0x66   : > { %857 = vmatprep.mubr.f32.mxu0 %v1927_v17  ;;  %1018 = vmatprep.mubr.f32.mxu1 %v1927_v17 }
  0x69   : > { %1786 = vmatmul.mubr.msk.f32.gmra.mxu0 %vm726_vm1, %v681_v4  ;;  %1802 = vmatmul.mubr.msk.f32.gmra.mxu1 %vm726_vm1, %v681_v4 }
  0x6a   : > { %863 = vmatprep.mubr.f32.mxu0 %v1927_v17  ;;  %1024 = vmatprep.mubr.f32.mxu1 %v1927_v17 }
  0x6d   : > { %1787 = vmatmul.mubr.msk.f32.gmra.mxu0 %vm726_vm1, %v682_v5  ;;  %1803 = vmatmul.mubr.msk.f32.gmra.mxu1 %vm726_vm1, %v682_v5  ;;  %v1163_v5 = vlaneseq }
  0x6e   : > { %869 = vmatprep.mubr.f32.mxu0 %v1927_v17  ;;  %1030 = vmatprep.mubr.f32.mxu1 %v1927_v17 }
  0x71   : > { %1788 = vmatmul.mubr.msk.f32.gmra.mxu0 %vm726_vm1, %v683_v6  ;;  %1804 = vmatmul.mubr.msk.f32.gmra.mxu1 %vm726_vm1, %v683_v6 }
  0x72   : > { %875 = vmatprep.mubr.f32.mxu0 %v1927_v17  ;;  %1036 = vmatprep.mubr.f32.mxu1 %v1927_v17 }
  0x75   : > { %1789 = vmatmul.mubr.msk.f32.gmra.mxu0 %vm726_vm1, %v684_v7  ;;  %1805 = vmatmul.mubr.msk.f32.gmra.mxu1 %vm726_vm1, %v684_v7 }
  0x76   : > { %881 = vmatprep.mubr.f32.mxu0 %v1927_v17  ;;  %1042 = vmatprep.mubr.f32.mxu1 %v1927_v17 }
  0x79   : > { %1790 = vmatmul.mubr.msk.f32.gmra.mxu0 %vm726_vm1, %v685_v8  ;;  %1806 = vmatmul.mubr.msk.f32.gmra.mxu1 %vm726_vm1, %v685_v8 }
  0x7a   : > { %887 = vmatprep.mubr.f32.mxu0 %v1927_v17  ;;  %1048 = vmatprep.mubr.f32.mxu1 %v1927_v17 }
  0x7d   : > { %1791 = vmatmul.mubr.msk.f32.gmra.mxu0 %vm726_vm1, %v686_v9  ;;  %1807 = vmatmul.mubr.msk.f32.gmra.mxu1 %vm726_vm1, %v686_v9 }
  0x7e   : > { %893 = vmatprep.mubr.f32.mxu0 %v1927_v17  ;;  %1054 = vmatprep.mubr.f32.mxu1 %v1927_v17 }
  0x81   : > { %1792 = vmatmul.mubr.msk.f32.gmra.mxu0 %vm726_vm1, %v687_v10  ;;  %1808 = vmatmul.mubr.msk.f32.gmra.mxu1 %vm726_vm1, %v687_v10  ;;  %v1164_v10 = vshrl.u32 %v1163_v5, 7  ;;  %v1311_v5 = vld [vmem:[%s2954_s5] sm:$0xf] }
  0x82   : > { %899 = vmatprep.mubr.f32.mxu0 %v1927_v17  ;;  %1060 = vmatprep.mubr.f32.mxu1 %v1927_v17 }
  0x85   : > { %1793 = vmatmul.mubr.msk.f32.gmra.mxu0 %vm726_vm1, %v688_v11  ;;  %1809 = vmatmul.mubr.msk.f32.gmra.mxu1 %vm726_vm1, %v688_v11 }
  0x86   : > { %905 = vmatprep.mubr.f32.mxu0 %v1927_v17  ;;  %1066 = vmatprep.mubr.f32.mxu1 %v1927_v17 }
  0x89   : > { %1794 = vmatmul.mubr.msk.f32.gmra.mxu0 %vm726_vm1, %v689_v12  ;;  %1810 = vmatmul.mubr.msk.f32.gmra.mxu1 %vm726_vm1, %v689_v12 }
  0x8a   : > { %911 = vmatprep.mubr.f32.mxu0 %v1927_v17  ;;  %1072 = vmatprep.mubr.f32.mxu1 %v1927_v17 }
  0x8d   : > { %1795 = vmatmul.mubr.msk.f32.gmra.mxu0 %vm726_vm1, %v690_v13  ;;  %1811 = vmatmul.mubr.msk.f32.gmra.mxu1 %vm726_vm1, %v690_v13 }
  0x8e   : > { %917 = vmatprep.mubr.f32.mxu0 %v1927_v17  ;;  %1078 = vmatprep.mubr.f32.mxu1 %v1927_v17 }
  0x91   : > { %1796 = vmatmul.mubr.msk.f32.gmra.mxu0 %vm726_vm1, %v691_v14  ;;  %1812 = vmatmul.mubr.msk.f32.gmra.mxu1 %vm726_vm1, %v691_v14 }
  0x92   : > { %923 = vmatprep.mubr.f32.mxu0 %v1927_v17  ;;  %1084 = vmatprep.mubr.f32.mxu1 %v1927_v17 }
  0x95   : > { %1797 = vmatmul.mubr.msk.f32.gmra.mxu0 %vm726_vm1, %v692_v15  ;;  %1813 = vmatmul.mubr.msk.f32.gmra.mxu1 %vm726_vm1, %v692_v15  ;;  %v1165_v15 = vsub.s32 0, %v1164_v10 }
  0x96   : > { %929 = vmatprep.mubr.f32.mxu0 %v1927_v17  ;;  %1090 = vmatprep.mubr.f32.mxu1 %v1927_v17 }
  0x99   : > { %1798 = vmatmul.mubr.msk.f32.gmra.mxu0 %vm726_vm1, %v693_v16  ;;  %1814 = vmatmul.mubr.msk.f32.gmra.mxu1 %vm726_vm1, %v693_v16  ;;  %v1173_v16 = vsub.s32 2, %v1164_v10 }
  0xdd   : > { %v2336_v18 = vpop.f32.mrf.mxu0  ;;  %v2338_v19 = vpop.f32.mrf.mxu1 }
  0xdf   : > { %v2340_v20 = vpop.f32.mrf.mxu0  ;;  %v2342_v21 = vpop.f32.mrf.mxu1 }
  0xe1   : > { %v2344_v22 = vpop.f32.mrf.mxu0  ;;  %v2346_v23 = vpop.f32.mrf.mxu1 }
  0xe3   : > { %v2348_v24 = vpop.f32.mrf.mxu0  ;;  %v2350_v17 = vpop.f32.mrf.mxu1 }
  0xe5   : > { %v2352_v25 = vpop.f32.mrf.mxu0  ;;  %v2354_v26 = vpop.f32.mrf.mxu1 }
  0xe7   : > { %v2356_v27 = vpop.f32.mrf.mxu0  ;;  %v2358_v28 = vpop.f32.mrf.mxu1 }
  0xe9   : > { %v2360_v29 = vpop.f32.mrf.mxu0  ;;  %v2362_v30 = vpop.f32.mrf.mxu1 }
  0xeb   : > { %v2364_v31 = vpop.f32.mrf.mxu0  ;;  %v2366_v32 = vpop.f32.mrf.mxu1 }
  0xed   : > { %v2368_v33 = vpop.f32.mrf.mxu0  ;;  %v2370_v34 = vpop.f32.mrf.mxu1 }
  0xef   : > { %v2372_v35 = vpop.f32.mrf.mxu0  ;;  %v2374_v36 = vpop.f32.mrf.mxu1 }
  0xf1   : > { %v2376_v37 = vpop.f32.mrf.mxu0  ;;  %v2378_v38 = vpop.f32.mrf.mxu1 }
  0xf3   : > { %v2380_v39 = vpop.f32.mrf.mxu0  ;;  %v2382_v40 = vpop.f32.mrf.mxu1 }
  0xf5   : > { %v2384_v41 = vpop.f32.mrf.mxu0  ;;  %v2386_v42 = vpop.f32.mrf.mxu1 }
  0xf7   : > { %v2388_v43 = vpop.f32.mrf.mxu0  ;;  %v2390_v44 = vpop.f32.mrf.mxu1 }
  0xf9   : > { %v2392_v45 = vpop.f32.mrf.mxu0  ;;  %v2394_v46 = vpop.f32.mrf.mxu1 }
  0xfb   : > { %v2396_v47 = vpop.f32.mrf.mxu0  ;;  %v2398_v48 = vpop.f32.mrf.mxu1 }
  0xfd   : > { %v2400_v49 = vpop.f32.mrf.mxu0  ;;  %v2402_v50 = vpop.f32.mrf.mxu1 }
  0xff   : > { %v2404_v51 = vpop.f32.mrf.mxu0  ;;  %v2406_v52 = vpop.f32.mrf.mxu1 }
 0x100   : > { %2987 = vst [vmem:[#allocation5_spill] sm:$0xff] %v2406_v52 }
 0x101   : > { %v2408_v53 = vpop.f32.mrf.mxu0  ;;  %v2410_v54 = vpop.f32.mrf.mxu1 }
 0x102   : > { %2988 = vst [vmem:[#allocation6_spill] sm:$0xff] %v2408_v53  ;;  %2989 = vst [vmem:[#allocation7_spill] sm:$0xff] %v2410_v54 }
 0x103   : > { %v2412_v55 = vpop.f32.mrf.mxu0  ;;  %v2414_v56 = vpop.f32.mrf.mxu1 }
 0x104   : > { %2990 = vst [vmem:[#allocation8_spill] sm:$0xff] %v2412_v55  ;;  %2991 = vst [vmem:[#allocation9_spill] sm:$0xff] %v2414_v56 }
 0x105   : > { %v2416_v57 = vpop.f32.mrf.mxu0  ;;  %v2418_v58 = vpop.f32.mrf.mxu1 }
 0x106   : > { %2992 = vst [vmem:[#allocation10_spill] sm:$0xff] %v2416_v57  ;;  %2993 = vst [vmem:[#allocation11_spill] sm:$0xff] %v2418_v58 }
 0x107   : > { %v2420_v59 = vpop.f32.mrf.mxu0  ;;  %v2422_v60 = vpop.f32.mrf.mxu1 }
 0x108   : > { %2994 = vst [vmem:[#allocation12_spill] sm:$0xff] %v2420_v59  ;;  %2995 = vst [vmem:[#allocation13_spill] sm:$0xff] %v2422_v60 }
 0x109   : > { %v2424_v61 = vpop.f32.mrf.mxu0  ;;  %v2426_v62 = vpop.f32.mrf.mxu1 }
 0x10a   : > { %2996 = vst [vmem:[#allocation14_spill] sm:$0xff] %v2424_v61  ;;  %2997 = vst [vmem:[#allocation15_spill] sm:$0xff] %v2426_v62 }
 0x10b   : > { %v2428_v63 = vpop.f32.mrf.mxu0  ;;  %v2430_v0 = vpop.f32.mrf.mxu1 }
 0x10c   : > { %2998 = vst [vmem:[#allocation16_spill] sm:$0xff] %v2428_v63  ;;  %2999 = vst [vmem:[#allocation17_spill] sm:$0xff] %v2430_v0 }
 0x10d   : > { %v2432_v1 = vpop.f32.mrf.mxu0  ;;  %v2434_v2 = vpop.f32.mrf.mxu1 }
 0x10e   : > { %3000 = vst [vmem:[#allocation18_spill] sm:$0xff] %v2432_v1  ;;  %3001 = vst [vmem:[#allocation19_spill] sm:$0xff] %v2434_v2 }
 0x10f   : > { %v2436_v3 = vpop.f32.mrf.mxu0  ;;  %v2438_v4 = vpop.f32.mrf.mxu1 }
 0x110   : > { %3002 = vst [vmem:[#allocation20_spill] sm:$0xff] %v2436_v3  ;;  %3003 = vst [vmem:[#allocation21_spill] sm:$0xff] %v2438_v4 }
 0x111   : > { %v2440_v6 = vpop.f32.mrf.mxu0  ;;  %v2442_v7 = vpop.f32.mrf.mxu1 }
 0x112   : > { %3004 = vst [vmem:[#allocation22_spill] sm:$0xff] %v2440_v6  ;;  %3005 = vst [vmem:[#allocation23_spill] sm:$0xff] %v2442_v7  ;;  %v2472_v7 = vrot.slane %v1311_v5, %v1165_v15 }
 0x113   : > { %v2444_v8 = vpop.f32.mrf.mxu0  ;;  %v2446_v9 = vpop.f32.mrf.mxu1 }
 0x114   : > { %3006 = vst [vmem:[#allocation24_spill] sm:$0xff] %v2444_v8  ;;  %3007 = vst [vmem:[#allocation25_spill] sm:$0xff] %v2446_v9  ;;  %v1161_v9 = vld [vmem:[%s2953_s4] sm:$0xf] }
 0x115   : > { %v2448_v11 = vpop.f32.mrf.mxu0  ;;  %v2450_v12 = vpop.f32.mrf.mxu1  ;;  %v2470_v8 = vrot.slane %v1161_v9, %v1165_v15 }
 0x116   : > { %3008 = vst [vmem:[#allocation26_spill] sm:$0xff] %v2448_v11  ;;  %3009 = vst [vmem:[#allocation27_spill] sm:$0xff] %v2450_v12  ;;  %v1169_v11 = vsub.s32 1, %v1164_v10 }
 0x117   : > { %v2452_v13 = vpop.f32.mrf.mxu0  ;;  %v2454_v14 = vpop.f32.mrf.mxu1 }
 0x118   : > { %3010 = vst [vmem:[#allocation28_spill] sm:$0xff] %v2452_v13  ;;  %3011 = vst [vmem:[#allocation29_spill] sm:$0xff] %v2454_v14  ;;  %v1177_v14 = vsub.s32 3, %v1164_v10  ;;  %v2483_v63 = vrot.slane %v1161_v9, %v1169_v11  ;;  %v2485_v15 = vrot.slane %v1311_v5, %v1169_v11 }
 0x119   : > { %v2456_v4 = vpop.f32.mrf.mxu0  ;;  %v2458_v6 = vpop.f32.mrf.mxu1 }
 0x11a   : > { %3012 = vst [vmem:[#allocation30_spill] sm:$0xff] %v2456_v4  ;;  %3013 = vst [vmem:[#allocation31_spill] sm:$0xff] %v2458_v6  ;;  %v2474_v6 = vrot.slane %v1161_v9, %v1173_v16  ;;  %v2476_v4 = vrot.slane %v1311_v5, %v1173_v16  ;;  %v2487_v61 = vrot.slane %v1161_v9, %v1177_v14 }
 0x11b   : > { %v2466_v12 = vpop.f32.mrf.mxu0  ;;  %v2468_v13 = vpop.f32.mrf.mxu1  ;;  %v2489_v16 = vrot.slane %v1311_v5, %v1177_v14 }
 0x11c   : > { %3014 = vst [vmem:[#allocation32_spill] sm:$0xff] %v2466_v12  ;;  %3015 = vst [vmem:[#allocation33_spill] sm:$0xff] %v2468_v13 }
 0x11d   : > { %v841_v3 = vpop.f32.mrf.mxu0  ;;  %v1002_v2 = vpop.f32.mrf.mxu1 }
 0x11e   : > { %v1097_v1 = vadd.f32 %v841_v3, %v2336_v18  ;;  %v1247_v12 = vsub.f32 %v2336_v18, %v841_v3  ;;  %v1099_v13 = vadd.f32 %v1002_v2, %v2338_v19  ;;  %v1249_v10 = vsub.f32 %v2338_v19, %v1002_v2 }
 0x11f   : > { %v843_v0 = vpop.f32.mrf.mxu0  ;;  %v1004_v62 = vpop.f32.mrf.mxu1 }
 0x120   : > { %v1183_v60 = vadd.f32 %v2470_v8, %v1097_v1  ;;  %v1333_v18 = vadd.f32 %v2472_v7, %v1247_v12  ;;  %v1185_v3 = vadd.f32 %v2474_v6, %v1099_v13  ;;  %v1335_v19 = vadd.f32 %v2476_v4, %v1249_v10 }
 0x121   : > { %v1098_v2 = vadd.f32 %v843_v0, %v2340_v20  ;;  %v1248_v11 = vsub.f32 %v2340_v20, %v843_v0  ;;  %v1100_v9 = vadd.f32 %v1004_v62, %v2342_v21  ;;  %v1250_v14 = vsub.f32 %v2342_v21, %v1004_v62  ;;  %v847_v5 = vpop.f32.mrf.mxu0  ;;  %v1008_v59 = vpop.f32.mrf.mxu1 }
 0x122   : > { %v1397_v58 = vmax.f32 %v1183_v60, 0.0  ;;  %v1461_v57 = vmul.f32 %v1333_v18, %v1333_v18  ;;  %v1399_v56 = vmax.f32 %v1185_v3, 0.0  ;;  %v1463_v1 = vmul.f32 %v1335_v19, %v1335_v19 }
 0x123   : > { %v1184_v12 = vadd.f32 %v2483_v63, %v1098_v2  ;;  %v1334_v13 = vadd.f32 %v2485_v15, %v1248_v11  ;;  %v1186_v10 = vadd.f32 %v2487_v61, %v1100_v9  ;;  %v1336_v55 = vadd.f32 %v2489_v16, %v1250_v14  ;;  %v849_v20 = vpop.f32.mrf.mxu0  ;;  %v1010_v0 = vpop.f32.mrf.mxu1 }
 0x124   : > { %v1525_v54 = vsub.f32 %v1397_v58, %v1461_v57  ;;  %v1527_v53 = vsub.f32 %v1399_v56, %v1463_v1  ;;  %v1101_v21 = vadd.f32 %v847_v5, %v2344_v22  ;;  %v1251_v60 = vsub.f32 %v2344_v22, %v847_v5 }
 0x125   : > { %v1398_v62 = vmax.f32 %v1184_v12, 0.0  ;;  %v1462_v18 = vmul.f32 %v1334_v13, %v1334_v13  ;;  %v1400_v3 = vmax.f32 %v1186_v10, 0.0  ;;  %v1464_v19 = vmul.f32 %v1336_v55, %v1336_v55  ;;  %v853_v2 = vpop.f32.mrf.mxu0  ;;  %v1014_v52 = vpop.f32.mrf.mxu1 }
 0x126   : > { %1589 = vst [vmem:[%s2510_s14] sm:$0xff] %v1525_v54  ;;  %1591 = vst [vmem:[%s2510_s14 + $0x10] sm:$0xff] %v1527_v53  ;;  %v1187_v56 = vadd.f32 %v2470_v8, %v1101_v21  ;;  %v1337_v57 = vadd.f32 %v2472_v7, %v1251_v60  ;;  %v1103_v22 = vadd.f32 %v1008_v59, %v2346_v23 }
 0x127   : > { %v1253_v58 = vsub.f32 %v2346_v23, %v1008_v59  ;;  %v1526_v11 = vsub.f32 %v1398_v62, %v1462_v18  ;;  %v1528_v55 = vsub.f32 %v1400_v3, %v1464_v19  ;;  %v1102_v9 = vadd.f32 %v849_v20, %v2348_v24  ;;  %v855_v5 = vpop.f32.mrf.mxu0  ;;  %v1016_v1 = vpop.f32.mrf.mxu1 }
 0x128   : > { %v1252_v14 = vsub.f32 %v2348_v24, %v849_v20  ;;  %v1401_v54 = vmax.f32 %v1187_v56, 0.0  ;;  %v1465_v12 = vmul.f32 %v1337_v57, %v1337_v57  ;;  %v1189_v53 = vadd.f32 %v2474_v6, %v1103_v22 }
 0x129   : > { %v1339_v13 = vadd.f32 %v2476_v4, %v1253_v58  ;;  %1590 = vst [vmem:[%s2510_s14 + $0x8] sm:$0xff] %v1526_v11  ;;  %1592 = vst [vmem:[%s2510_s14 + $0x18] sm:$0xff] %v1528_v55  ;;  %v1188_v10 = vadd.f32 %v2483_v63, %v1102_v9  ;;  %v1104_v59 = vadd.f32 %v1010_v0, %v2350_v17  ;;  %v859_v24 = vpop.f32.mrf.mxu0  ;;  %v2528_v20 = vpop.f32.mrf.mxu1 }
 0x12a   : > { %v1338_v23 = vadd.f32 %v2485_v15, %v1252_v14  ;;  %v1254_v21 = vsub.f32 %v2350_v17, %v1010_v0  ;;  %v1529_v60 = vsub.f32 %v1401_v54, %v1465_v12  ;;  %v1403_v62 = vmax.f32 %v1189_v53, 0.0 }
 0x12b   : > { %v1467_v18 = vmul.f32 %v1339_v13, %v1339_v13  ;;  %v1105_v3 = vadd.f32 %v853_v2, %v2352_v25  ;;  %v1402_v19 = vmax.f32 %v1188_v10, 0.0  ;;  %v1190_v57 = vadd.f32 %v2487_v61, %v1104_v59  ;;  %v861_v58 = vpop.f32.mrf.mxu0  ;;  %v2533_v11 = vpop.f32.mrf.mxu1 }
 0x12c   : > { %v1466_v56 = vmul.f32 %v1338_v23, %v1338_v23  ;;  %v1340_v22 = vadd.f32 %v2489_v16, %v1254_v21  ;;  %1593 = vst [vmem:[%s2510_s14 + $0x20] sm:$0xff] %v1529_v60  ;;  %v1255_v55 = vsub.f32 %v2352_v25, %v853_v2  ;;  %v1107_v9 = vadd.f32 %v1014_v52, %v2354_v26 }
 0x12d   : > { %v1531_v17 = vsub.f32 %v1403_v62, %v1467_v18  ;;  %v1191_v0 = vadd.f32 %v2470_v8, %v1105_v3  ;;  %v1404_v54 = vmax.f32 %v1190_v57, 0.0  ;;  %v1257_v53 = vsub.f32 %v2354_v26, %v1014_v52  ;;  %v2540_v13 = vpop.f32.mrf.mxu0  ;;  %v2542_v10 = vpop.f32.mrf.mxu1 }
 0x12e   : > { %v1530_v14 = vsub.f32 %v1402_v19, %v1466_v56  ;;  %v1468_v12 = vmul.f32 %v1340_v22, %v1340_v22  ;;  %v1341_v23 = vadd.f32 %v2472_v7, %v1255_v55  ;;  %v1193_v21 = vadd.f32 %v2474_v6, %v1107_v9 }
 0x12f   : > { %1595 = vst [vmem:[%s2510_s14 + $0x30] sm:$0xff] %v1531_v17  ;;  %v1405_v59 = vmax.f32 %v1191_v0, 0.0  ;;  %v1106_v25 = vadd.f32 %v855_v5, %v2356_v27  ;;  %v1343_v60 = vadd.f32 %v2476_v4, %v1257_v53  ;;  %v1256_v62 = vsub.f32 %v2356_v27, %v855_v5  ;;  %v2552_v52 = vpop.f32.mrf.mxu0  ;;  %v2556_v57 = vpop.f32.mrf.mxu1 }
 0x130   : > { %1594 = vst [vmem:[%s2510_s14 + $0x28] sm:$0xff] %v1530_v14  ;;  %v1532_v2 = vsub.f32 %v1404_v54, %v1468_v12  ;;  %v1108_v26 = vadd.f32 %v1016_v1, %v2358_v28  ;;  %v1469_v18 = vmul.f32 %v1341_v23, %v1341_v23  ;;  %v1407_v3 = vmax.f32 %v1193_v21, 0.0 }
 0x131   : > { %v1192_v19 = vadd.f32 %v2483_v63, %v1106_v25  ;;  %v1258_v56 = vsub.f32 %v2358_v28, %v1016_v1  ;;  %v1471_v22 = vmul.f32 %v1343_v60, %v1343_v60  ;;  %v1342_v17 = vadd.f32 %v2485_v15, %v1256_v62  ;;  %v2564_v54 = vpop.f32.mrf.mxu0 }
 0x132   : > { %1596 = vst [vmem:[%s2510_s14 + $0x38] sm:$0xff] %v1532_v2  ;;  %v1194_v0 = vadd.f32 %v2487_v61, %v1108_v26  ;;  %v1109_v27 = vadd.f32 %v859_v24, %v2360_v29  ;;  %v1533_v5 = vsub.f32 %v1405_v59, %v1469_v18  ;;  %v1259_v14 = vsub.f32 %v2360_v29, %v859_v24  ;;  %v2573_v2 = vpop.f32.mrf.mxu1 }
 0x133   : > { %v1406_v55 = vmax.f32 %v1192_v19, 0.0  ;;  %v1344_v9 = vadd.f32 %v2489_v16, %v1258_v56  ;;  %v1535_v28 = vsub.f32 %v1407_v3, %v1471_v22  ;;  %v1470_v1 = vmul.f32 %v1342_v17, %v1342_v17  ;;  %v2580_v56 = vpop.f32.mrf.mxu0 }
 0x134   : > { %v1408_v12 = vmax.f32 %v1194_v0, 0.0  ;;  %v1195_v53 = vadd.f32 %v2470_v8, %v1109_v27  ;;  %1597 = vst [vmem:[%s2510_s14 + $0x40] sm:$0xff] %v1533_v5  ;;  %v1345_v21 = vadd.f32 %v2472_v7, %v1259_v14  ;;  %v1111_v59 = vadd.f32 %v2528_v20, %v2362_v30  ;;  %v2592_v5 = vpop.f32.mrf.mxu1 }
 0x135   : > { %v1472_v23 = vmul.f32 %v1344_v9, %v1344_v9  ;;  %v1261_v25 = vsub.f32 %v2362_v30, %v2528_v20  ;;  %1599 = vst [vmem:[%s2510_s14 + $0x50] sm:$0xff] %v1535_v28  ;;  %v1534_v29 = vsub.f32 %v1406_v55, %v1470_v1  ;;  %v1110_v60 = vadd.f32 %v861_v58, %v2364_v31 }
 0x136   : > { %v1409_v24 = vmax.f32 %v1195_v53, 0.0  ;;  %v1260_v62 = vsub.f32 %v2364_v31, %v861_v58  ;;  %v1473_v18 = vmul.f32 %v1345_v21, %v1345_v21  ;;  %v1197_v3 = vadd.f32 %v2474_v6, %v1111_v59  ;;  %v2602_v53 = vpop.f32.mrf.mxu0 }
 0x137   : > { %v1536_v26 = vsub.f32 %v1408_v12, %v1472_v23  ;;  %v1347_v19 = vadd.f32 %v2476_v4, %v1261_v25  ;;  %1598 = vst [vmem:[%s2510_s14 + $0x48] sm:$0xff] %v1534_v29  ;;  %v1196_v30 = vadd.f32 %v2483_v63, %v1110_v60  ;;  %v1112_v22 = vadd.f32 %v2533_v11, %v2366_v32 }
 0x138   : > { %v1346_v20 = vadd.f32 %v2485_v15, %v1260_v62  ;;  %v1262_v31 = vsub.f32 %v2366_v32, %v2533_v11  ;;  %v1537_v58 = vsub.f32 %v1409_v24, %v1473_v18  ;;  %v1411_v17 = vmax.f32 %v1197_v3, 0.0 }
 0x139   : > { %1600 = vst [vmem:[%s2510_s14 + $0x58] sm:$0xff] %v1536_v26  ;;  %v1475_v0 = vmul.f32 %v1347_v19, %v1347_v19  ;;  %v1113_v27 = vadd.f32 %v2540_v13, %v2368_v33  ;;  %v1410_v55 = vmax.f32 %v1196_v30, 0.0  ;;  %v1198_v14 = vadd.f32 %v2487_v61, %v1112_v22 }
 0x13a   : > { %v1474_v9 = vmul.f32 %v1346_v20, %v1346_v20  ;;  %v1348_v28 = vadd.f32 %v2489_v16, %v1262_v31  ;;  %1601 = vst [vmem:[%s2510_s14 + $0x60] sm:$0xff] %v1537_v58  ;;  %v1263_v11 = vsub.f32 %v2368_v33, %v2540_v13  ;;  %v1115_v12 = vadd.f32 %v2542_v10, %v2370_v34  ;;  %v2611_v13 = vpop.f32.mrf.mxu1  ;;  %v2622_v20 = vpop.f32.mrf.mxu0 }
 0x13b   : > { %v1539_v1 = vsub.f32 %v1411_v17, %v1475_v0  ;;  %v1199_v32 = vadd.f32 %v2470_v8, %v1113_v27  ;;  %v1412_v21 = vmax.f32 %v1198_v14, 0.0  ;;  %v1265_v25 = vsub.f32 %v2370_v34, %v2542_v10 }
 0x13c   : > { %v1538_v23 = vsub.f32 %v1410_v55, %v1474_v9  ;;  %v1476_v59 = vmul.f32 %v1348_v28, %v1348_v28  ;;  %v1349_v29 = vadd.f32 %v2472_v7, %v1263_v11  ;;  %v1201_v60 = vadd.f32 %v2474_v6, %v1115_v12  ;;  %v2641_v12 = vpop.f32.mrf.mxu0 }
 0x13d   : > { %1603 = vst [vmem:[%s2510_s14 + $0x70] sm:$0xff] %v1539_v1  ;;  %v1413_v24 = vmax.f32 %v1199_v32, 0.0  ;;  %v1114_v33 = vadd.f32 %v2552_v52, %v2372_v35  ;;  %v1351_v26 = vadd.f32 %v2476_v4, %v1265_v25  ;;  %v1264_v18 = vsub.f32 %v2372_v35, %v2552_v52 }
 0x13e   : > { %1602 = vst [vmem:[%s2510_s14 + $0x68] sm:$0xff] %v1538_v23  ;;  %v1540_v62 = vsub.f32 %v1412_v21, %v1476_v59  ;;  %v1116_v34 = vadd.f32 %v2556_v57, %v2374_v36  ;;  %v1477_v10 = vmul.f32 %v1349_v29, %v1349_v29  ;;  %v1415_v3 = vmax.f32 %v1201_v60, 0.0 }
 0x13f   : > { %v1200_v19 = vadd.f32 %v2483_v63, %v1114_v33  ;;  %v1266_v30 = vsub.f32 %v2374_v36, %v2556_v57  ;;  %v1479_v22 = vmul.f32 %v1351_v26, %v1351_v26  ;;  %v1350_v31 = vadd.f32 %v2485_v15, %v1264_v18  ;;  %v2632_v57 = vpop.f32.mrf.mxu1 }
 0x140   : > { %1604 = vst [vmem:[%s2510_s14 + $0x78] sm:$0xff] %v1540_v62  ;;  %v1202_v58 = vadd.f32 %v2487_v61, %v1116_v34  ;;  %v1117_v35 = vadd.f32 %v2564_v54, %v2376_v37  ;;  %v1541_v52 = vsub.f32 %v1413_v24, %v1477_v10  ;;  %v1267_v36 = vsub.f32 %v2376_v37, %v2564_v54  ;;  %v2662_v34 = vpop.f32.mrf.mxu0 }
 0x141   : > { %v1414_v17 = vmax.f32 %v1200_v19, 0.0  ;;  %v1352_v0 = vadd.f32 %v2489_v16, %v1266_v30  ;;  %v1543_v27 = vsub.f32 %v1415_v3, %v1479_v22  ;;  %v1478_v55 = vmul.f32 %v1350_v31, %v1350_v31  ;;  %v2650_v60 = vpop.f32.mrf.mxu1 }
 0x142   : > { %v1416_v9 = vmax.f32 %v1202_v58, 0.0  ;;  %v1203_v14 = vadd.f32 %v2470_v8, %v1117_v35  ;;  %1605 = vst [vmem:[%s2510_s14 + $0x80] sm:$0xff] %v1541_v52  ;;  %v1353_v1 = vadd.f32 %v2472_v7, %v1267_v36  ;;  %v1119_v32 = vadd.f32 %v2573_v2, %v2378_v38 }
 0x143   : > { %v1480_v28 = vmul.f32 %v1352_v0, %v1352_v0  ;;  %v1269_v11 = vsub.f32 %v2378_v38, %v2573_v2  ;;  %1607 = vst [vmem:[%s2510_s14 + $0x90] sm:$0xff] %v1543_v27  ;;  %v1542_v37 = vsub.f32 %v1414_v17, %v1478_v55  ;;  %v1118_v23 = vadd.f32 %v2580_v56, %v2380_v39  ;;  %v2672_v58 = vpop.f32.mrf.mxu1 }
 0x144   : > { %v1417_v54 = vmax.f32 %v1203_v14, 0.0  ;;  %v1268_v21 = vsub.f32 %v2380_v39, %v2580_v56  ;;  %v1481_v25 = vmul.f32 %v1353_v1, %v1353_v1  ;;  %v1205_v29 = vadd.f32 %v2474_v6, %v1119_v32 }
 0x145   : > { %v1544_v59 = vsub.f32 %v1416_v9, %v1480_v28  ;;  %v1355_v24 = vadd.f32 %v2476_v4, %v1269_v11  ;;  %1606 = vst [vmem:[%s2510_s14 + $0x88] sm:$0xff] %v1542_v37  ;;  %v1204_v38 = vadd.f32 %v2483_v63, %v1118_v23  ;;  %v1120_v33 = vadd.f32 %v2592_v5, %v2382_v40  ;;  %v2692_v37 = vpop.f32.mrf.mxu1 }
 0x146   : > { %v1354_v2 = vadd.f32 %v2485_v15, %v1268_v21  ;;  %v1270_v39 = vsub.f32 %v2382_v40, %v2592_v5  ;;  %v1545_v56 = vsub.f32 %v1417_v54, %v1481_v25  ;;  %v1419_v62 = vmax.f32 %v1205_v29, 0.0 }
 0x147   : > { %1608 = vst [vmem:[%s2510_s14 + $0x98] sm:$0xff] %v1544_v59  ;;  %v1483_v26 = vmul.f32 %v1355_v24, %v1355_v24  ;;  %v1121_v18 = vadd.f32 %v2602_v53, %v2384_v41  ;;  %v1418_v10 = vmax.f32 %v1204_v38, 0.0  ;;  %v1206_v19 = vadd.f32 %v2487_v61, %v1120_v33 }
 0x148   : > { %v1482_v3 = vmul.f32 %v1354_v2, %v1354_v2  ;;  %v1356_v30 = vadd.f32 %v2489_v16, %v1270_v39  ;;  %1609 = vst [vmem:[%s2510_s14 + $0xa0] sm:$0xff] %v1545_v56  ;;  %v1271_v5 = vsub.f32 %v2384_v41, %v2602_v53  ;;  %v1123_v31 = vadd.f32 %v2611_v13, %v2386_v42  ;;  %v2681_v53 = vpop.f32.mrf.mxu0 }
 0x149   : > { %v1547_v22 = vsub.f32 %v1419_v62, %v1483_v26  ;;  %v1207_v40 = vadd.f32 %v2470_v8, %v1121_v18  ;;  %v1420_v52 = vmax.f32 %v1206_v19, 0.0  ;;  %v1273_v0 = vsub.f32 %v2386_v42, %v2611_v13  ;;  %v1052_v26 = vpop.f32.mrf.mxu1 }
 0x14a   : > { %v1546_v35 = vsub.f32 %v1418_v10, %v1482_v3  ;;  %v1484_v17 = vmul.f32 %v1356_v30, %v1356_v30  ;;  %v1357_v36 = vadd.f32 %v2472_v7, %v1271_v5  ;;  %v1209_v55 = vadd.f32 %v2474_v6, %v1123_v31 }
 0x14b   : > { %1611 = vst [vmem:[%s2510_s14 + $0xb0] sm:$0xff] %v1547_v22  ;;  %v1421_v27 = vmax.f32 %v1207_v40, 0.0  ;;  %v1122_v41 = vadd.f32 %v2622_v20, %v2388_v43  ;;  %v1359_v14 = vadd.f32 %v2476_v4, %v1273_v0  ;;  %v1272_v28 = vsub.f32 %v2388_v43, %v2622_v20 }
 0x14c   : > { %1610 = vst [vmem:[%s2510_s14 + $0xa8] sm:$0xff] %v1546_v35  ;;  %v1548_v9 = vsub.f32 %v1420_v52, %v1484_v17  ;;  %v1124_v42 = vadd.f32 %v2632_v57, %v2390_v44  ;;  %v1485_v13 = vmul.f32 %v1357_v36, %v1357_v36  ;;  %v1423_v1 = vmax.f32 %v1209_v55, 0.0  ;;  %v1056_v17 = vpop.f32.mrf.mxu1 }
 0x14d   : > { %v1208_v32 = vadd.f32 %v2483_v63, %v1122_v41  ;;  %v1274_v11 = vsub.f32 %v2390_v44, %v2632_v57  ;;  %v1487_v54 = vmul.f32 %v1359_v14, %v1359_v14  ;;  %v1358_v23 = vadd.f32 %v2485_v15, %v1272_v28  ;;  %v2702_v57 = vpop.f32.mrf.mxu0 }
 0x14e   : > { %1612 = vst [vmem:[%s2510_s14 + $0xb8] sm:$0xff] %v1548_v9  ;;  %v1210_v21 = vadd.f32 %v2487_v61, %v1124_v42  ;;  %v1125_v43 = vadd.f32 %v2641_v12, %v2392_v45  ;;  %v1549_v20 = vsub.f32 %v1421_v27, %v1485_v13  ;;  %v1275_v44 = vsub.f32 %v2392_v45, %v2641_v12 }
 0x14f   : > { %v1422_v59 = vmax.f32 %v1208_v32, 0.0  ;;  %v1360_v25 = vadd.f32 %v2489_v16, %v1274_v11  ;;  %v1551_v29 = vsub.f32 %v1423_v1, %v1487_v54  ;;  %v1486_v24 = vmul.f32 %v1358_v23, %v1358_v23  ;;  %v895_v40 = vpop.f32.mrf.mxu0 }
 0x150   : > { %v1424_v38 = vmax.f32 %v1210_v21, 0.0  ;;  %v1211_v2 = vadd.f32 %v2470_v8, %v1125_v43  ;;  %1613 = vst [vmem:[%s2510_s14 + $0xc0] sm:$0xff] %v1549_v20  ;;  %v1361_v39 = vadd.f32 %v2472_v7, %v1275_v44  ;;  %v1127_v56 = vadd.f32 %v2650_v60, %v2394_v46  ;;  %v3016_v20 = vld [vmem:[#allocation5_spill] sm:$0xff] }
 0x151   : > { %v1488_v33 = vmul.f32 %v1360_v25, %v1360_v25  ;;  %v1277_v62 = vsub.f32 %v2394_v46, %v2650_v60  ;;  %1615 = vst [vmem:[%s2510_s14 + $0xd0] sm:$0xff] %v1551_v29  ;;  %v1550_v45 = vsub.f32 %v1422_v59, %v1486_v24  ;;  %v1126_v18 = vadd.f32 %v2662_v34, %v2396_v47  ;;  %v897_v14 = vpop.f32.mrf.mxu0 }
 0x152   : > { %v1425_v12 = vmax.f32 %v1211_v2, 0.0  ;;  %v1276_v10 = vsub.f32 %v2396_v47, %v2662_v34  ;;  %v1489_v19 = vmul.f32 %v1361_v39, %v1361_v39  ;;  %v1213_v30 = vadd.f32 %v2474_v6, %v1127_v56 }
 0x153   : > { %v1552_v3 = vsub.f32 %v1424_v38, %v1488_v33  ;;  %v1363_v22 = vadd.f32 %v2476_v4, %v1277_v62  ;;  %1614 = vst [vmem:[%s2510_s14 + $0xc8] sm:$0xff] %v1550_v45  ;;  %v1212_v46 = vadd.f32 %v2483_v63, %v1126_v18  ;;  %v1128_v5 = vadd.f32 %v2672_v58, %v2398_v48  ;;  %v901_v29 = vpop.f32.mrf.mxu0  ;;  %v3017_v33 = vld [vmem:[#allocation6_spill] sm:$0xff] }
 0x154   : > { %v1362_v60 = vadd.f32 %v2485_v15, %v1276_v10  ;;  %v1278_v31 = vsub.f32 %v2398_v48, %v2672_v58  ;;  %v1553_v47 = vsub.f32 %v1425_v12, %v1489_v19  ;;  %v1427_v34 = vmax.f32 %v1213_v30, 0.0  ;;  %v3018_v30 = vld [vmem:[#allocation7_spill] sm:$0xff] }
 0x155   : > { %1616 = vst [vmem:[%s2510_s14 + $0xd8] sm:$0xff] %v1552_v3  ;;  %v1491_v35 = vmul.f32 %v1363_v22, %v1363_v22  ;;  %v1129_v52 = vadd.f32 %v2681_v53, %v2400_v49  ;;  %v1426_v0 = vmax.f32 %v1212_v46, 0.0  ;;  %v1214_v27 = vadd.f32 %v2487_v61, %v1128_v5 }
 0x156   : > { %v1490_v36 = vmul.f32 %v1362_v60, %v1362_v60  ;;  %v1364_v55 = vadd.f32 %v2489_v16, %v1278_v31  ;;  %1617 = vst [vmem:[%s2510_s14 + $0xe0] sm:$0xff] %v1553_v47  ;;  %v1279_v58 = vsub.f32 %v2400_v49, %v2681_v53  ;;  %v1131_v9 = vadd.f32 %v2692_v37, %v2402_v50  ;;  %v1058_v53 = vpop.f32.mrf.mxu1  ;;  %v903_v60 = vpop.f32.mrf.mxu0  ;;  %v3019_v31 = vld [vmem:[#allocation8_spill] sm:$0xff] }
 0x157   : > { %v1555_v41 = vsub.f32 %v1427_v34, %v1491_v35  ;;  %v1215_v48 = vadd.f32 %v2470_v8, %v1129_v52  ;;  %v1428_v42 = vmax.f32 %v1214_v27, 0.0  ;;  %v1281_v1 = vsub.f32 %v2402_v50, %v2692_v37 }
 0x158   : > { %v1554_v28 = vsub.f32 %v1426_v0, %v1490_v36  ;;  %v1492_v13 = vmul.f32 %v1364_v55, %v1364_v55  ;;  %v1365_v32 = vadd.f32 %v2472_v7, %v1279_v58  ;;  %v1217_v54 = vadd.f32 %v2474_v6, %v1131_v9  ;;  %v1062_v45 = vpop.f32.mrf.mxu1 }
 0x159   : > { %1619 = vst [vmem:[%s2510_s14 + $0xf0] sm:$0xff] %v1555_v41  ;;  %v1429_v11 = vmax.f32 %v1215_v48, 0.0  ;;  %v1130_v49 = vadd.f32 %v2702_v57, %v2404_v51  ;;  %v1367_v21 = vadd.f32 %v2476_v4, %v1281_v1  ;;  %v1280_v43 = vsub.f32 %v2404_v51, %v2702_v57  ;;  %v3020_v41 = vld [vmem:[#allocation9_spill] sm:$0xff]  ;;  %v907_v1 = vpop.f32.mrf.mxu0 }
 0x15a   : > { %1618 = vst [vmem:[%s2510_s14 + $0xe8] sm:$0xff] %v1554_v28  ;;  %v1556_v23 = vsub.f32 %v1428_v42, %v1492_v13  ;;  %v1132_v50 = vadd.f32 %v1052_v26, %v3016_v20  ;;  %v1493_v37 = vmul.f32 %v1365_v32, %v1365_v32  ;;  %v1431_v59 = vmax.f32 %v1217_v54, 0.0  ;;  %v1064_v27 = vpop.f32.mrf.mxu1  ;;  %v3021_v42 = vld [vmem:[#allocation10_spill] sm:$0xff] }
 0x15b   : > { %v1216_v25 = vadd.f32 %v2483_v63, %v1130_v49  ;;  %v1282_v44 = vsub.f32 %v3016_v20, %v1052_v26  ;;  %v1495_v24 = vmul.f32 %v1367_v21, %v1367_v21  ;;  %v1366_v38 = vadd.f32 %v2485_v15, %v1280_v43  ;;  %v3022_v43 = vld [vmem:[#allocation11_spill] sm:$0xff] }
 0x15c   : > { %1620 = vst [vmem:[%s2510_s14 + $0xf8] sm:$0xff] %v1556_v23  ;;  %v1218_v2 = vadd.f32 %v2487_v61, %v1132_v50  ;;  %v1133_v39 = vadd.f32 %v895_v40, %v3017_v33  ;;  %v1557_v51 = vsub.f32 %v1429_v11, %v1493_v37  ;;  %v1283_v62 = vsub.f32 %v3017_v33, %v895_v40  ;;  %v1068_v50 = vpop.f32.mrf.mxu1  ;;  %v3023_v33 = vld [vmem:[#allocation12_spill] sm:$0xff] }
 0x15d   : > { %v1430_v57 = vmax.f32 %v1216_v25, 0.0  ;;  %v1368_v56 = vadd.f32 %v2489_v16, %v1282_v44  ;;  %v1559_v12 = vsub.f32 %v1431_v59, %v1495_v24  ;;  %v1494_v26 = vmul.f32 %v1366_v38, %v1366_v38 }
 0x15e   : > { %v1432_v18 = vmax.f32 %v1218_v2, 0.0  ;;  %v1219_v10 = vadd.f32 %v2470_v8, %v1133_v39  ;;  %1621 = vst [vmem:[%s2510_s14 + $0x100] sm:$0xff] %v1557_v51  ;;  %v1369_v19 = vadd.f32 %v2472_v7, %v1283_v62  ;;  %v1135_v22 = vadd.f32 %v1056_v17, %v3018_v30  ;;  %v909_v51 = vpop.f32.mrf.mxu0  ;;  %v3024_v62 = vld [vmem:[#allocation13_spill] sm:$0xff] }
 0x15f   : > { %v1496_v3 = vmul.f32 %v1368_v56, %v1368_v56  ;;  %v1285_v46 = vsub.f32 %v3018_v30, %v1056_v17  ;;  %1623 = vst [vmem:[%s2510_s14 + $0x110] sm:$0xff] %v1559_v12  ;;  %v1558_v5 = vsub.f32 %v1430_v57, %v1494_v26  ;;  %v1134_v47 = vadd.f32 %v897_v14, %v3019_v31 }
 0x160   : > { %v1433_v40 = vmax.f32 %v1219_v10, 0.0  ;;  %v1284_v34 = vsub.f32 %v3019_v31, %v897_v14  ;;  %v1497_v52 = vmul.f32 %v1369_v19, %v1369_v19  ;;  %v1221_v0 = vadd.f32 %v2474_v6, %v1135_v22 }
 0x161   : > { %v1560_v35 = vsub.f32 %v1432_v18, %v1496_v3  ;;  %v1371_v36 = vadd.f32 %v2476_v4, %v1285_v46  ;;  %1622 = vst [vmem:[%s2510_s14 + $0x108] sm:$0xff] %v1558_v5  ;;  %v1220_v17 = vadd.f32 %v2483_v63, %v1134_v47  ;;  %v1136_v48 = vadd.f32 %v1058_v53, %v3020_v41  ;;  %v1070_v3 = vpop.f32.mrf.mxu1  ;;  %v3025_v46 = vld [vmem:[#allocation14_spill] sm:$0xff] }
 0x162   : > { %v1370_v55 = vadd.f32 %v2485_v15, %v1284_v34  ;;  %v1286_v58 = vsub.f32 %v3020_v41, %v1058_v53  ;;  %v1561_v9 = vsub.f32 %v1433_v40, %v1497_v52  ;;  %v1435_v14 = vmax.f32 %v1221_v0, 0.0  ;;  %v913_v34 = vpop.f32.mrf.mxu0 }
 0x163   : > { %1624 = vst [vmem:[%s2510_s14 + $0x118] sm:$0xff] %v1560_v35  ;;  %v1499_v28 = vmul.f32 %v1371_v36, %v1371_v36  ;;  %v1137_v13 = vadd.f32 %v901_v29, %v3021_v42  ;;  %v1434_v32 = vmax.f32 %v1220_v17, 0.0  ;;  %v1222_v54 = vadd.f32 %v2487_v61, %v1136_v48 }
 0x164   : > { %v1498_v11 = vmul.f32 %v1370_v55, %v1370_v55  ;;  %v1372_v49 = vadd.f32 %v2489_v16, %v1286_v58  ;;  %1625 = vst [vmem:[%s2510_s14 + $0x120] sm:$0xff] %v1561_v9  ;;  %v1287_v53 = vsub.f32 %v3021_v42, %v901_v29  ;;  %v1139_v20 = vadd.f32 %v1062_v45, %v3022_v43  ;;  %v3026_v55 = vld [vmem:[#allocation15_spill] sm:$0xff]  ;;  %v1074_v58 = vpop.f32.mrf.mxu1 }
 0x165   : > { %v1563_v23 = vsub.f32 %v1435_v14, %v1499_v28  ;;  %v1223_v21 = vadd.f32 %v2470_v8, %v1137_v13  ;;  %v1436_v59 = vmax.f32 %v1222_v54, 0.0  ;;  %v1289_v44 = vsub.f32 %v3022_v43, %v1062_v45  ;;  %v3027_v28 = vld [vmem:[#allocation16_spill] sm:$0xff] }
 0x166   : > { %v1562_v37 = vsub.f32 %v1434_v32, %v1498_v11  ;;  %v1500_v25 = vmul.f32 %v1372_v49, %v1372_v49  ;;  %v1373_v24 = vadd.f32 %v2472_v7, %v1287_v53  ;;  %v1225_v2 = vadd.f32 %v2474_v6, %v1139_v20  ;;  %v915_v49 = vpop.f32.mrf.mxu0  ;;  %v3028_v53 = vld [vmem:[#allocation17_spill] sm:$0xff] }
 0x167   : > { %1627 = vst [vmem:[%s2510_s14 + $0x130] sm:$0xff] %v1563_v23  ;;  %v1437_v38 = vmax.f32 %v1223_v21, 0.0  ;;  %v1138_v39 = vadd.f32 %v903_v60, %v3023_v33  ;;  %v1375_v57 = vadd.f32 %v2476_v4, %v1289_v44  ;;  %v1288_v56 = vsub.f32 %v3023_v33, %v903_v60 }
 0x168   : > { %1626 = vst [vmem:[%s2510_s14 + $0x128] sm:$0xff] %v1562_v37  ;;  %v1564_v29 = vsub.f32 %v1436_v59, %v1500_v25  ;;  %v1140_v12 = vadd.f32 %v1064_v27, %v3024_v62  ;;  %v1501_v26 = vmul.f32 %v1373_v24, %v1373_v24  ;;  %v1439_v45 = vmax.f32 %v1225_v2, 0.0  ;;  %v3029_v25 = vld [vmem:[#allocation18_spill] sm:$0xff]  ;;  %v1076_v24 = vpop.f32.mrf.mxu1 }
 0x169   : > { %v1224_v18 = vadd.f32 %v2483_v63, %v1138_v39  ;;  %v1290_v10 = vsub.f32 %v3024_v62, %v1064_v27  ;;  %v1503_v19 = vmul.f32 %v1375_v57, %v1375_v57  ;;  %v1374_v30 = vadd.f32 %v2485_v15, %v1288_v56  ;;  %v3030_v56 = vld [vmem:[#allocation19_spill] sm:$0xff] }
 0x16a   : > { %1628 = vst [vmem:[%s2510_s14 + $0x138] sm:$0xff] %v1564_v29  ;;  %v1226_v22 = vadd.f32 %v2487_v61, %v1140_v12  ;;  %v1141_v5 = vadd.f32 %v907_v1, %v3025_v46  ;;  %v1565_v60 = vsub.f32 %v1437_v38, %v1501_v26  ;;  %v1291_v47 = vsub.f32 %v3025_v46, %v907_v1  ;;  %v919_v12 = vpop.f32.mrf.mxu0 }
 0x16b   : > { %v1438_v40 = vmax.f32 %v1224_v18, 0.0  ;;  %v1376_v31 = vadd.f32 %v2489_v16, %v1290_v10  ;;  %v1567_v35 = vsub.f32 %v1439_v45, %v1503_v19  ;;  %v1502_v52 = vmul.f32 %v1374_v30, %v1374_v30 }
 0x16c   : > { %v1440_v0 = vmax.f32 %v1226_v22, 0.0  ;;  %v1227_v36 = vadd.f32 %v2470_v8, %v1141_v5  ;;  %1629 = vst [vmem:[%s2510_s14 + $0x140] sm:$0xff] %v1565_v60  ;;  %v1377_v17 = vadd.f32 %v2472_v7, %v1291_v47  ;;  %v1143_v41 = vadd.f32 %v1068_v50, %v3026_v55  ;;  %v3031_v22 = vld [vmem:[#allocation20_spill] sm:$0xff]  ;;  %v1080_v5 = vpop.f32.mrf.mxu1  ;;  %v3032_v47 = vld [vmem:[#allocation21_spill] sm:$0xff] }
 0x16d   : > { %v1504_v27 = vmul.f32 %v1376_v31, %v1376_v31  ;;  %v1293_v48 = vsub.f32 %v3026_v55, %v1068_v50  ;;  %1631 = vst [vmem:[%s2510_s14 + $0x150] sm:$0xff] %v1567_v35  ;;  %v1566_v9 = vsub.f32 %v1438_v40, %v1502_v52  ;;  %v1142_v42 = vadd.f32 %v909_v51, %v3027_v28 }
 0x16e   : > { %v1441_v14 = vmax.f32 %v1227_v36, 0.0  ;;  %v1292_v13 = vsub.f32 %v3027_v28, %v909_v51  ;;  %v1505_v32 = vmul.f32 %v1377_v17, %v1377_v17  ;;  %v1229_v11 = vadd.f32 %v2474_v6, %v1143_v41 }
 0x16f   : > { %v1568_v1 = vsub.f32 %v1440_v0, %v1504_v27  ;;  %v1379_v54 = vadd.f32 %v2476_v4, %v1293_v48  ;;  %1630 = vst [vmem:[%s2510_s14 + $0x148] sm:$0xff] %v1566_v9  ;;  %v1228_v23 = vadd.f32 %v2483_v63, %v1142_v42  ;;  %v1144_v43 = vadd.f32 %v1070_v3, %v3028_v53  ;;  %v921_v27 = vpop.f32.mrf.mxu0  ;;  %v3033_v48 = vld [vmem:[#allocation22_spill] sm:$0xff] }
 0x170   : > { %v1378_v21 = vadd.f32 %v2485_v15, %v1292_v13  ;;  %v1294_v20 = vsub.f32 %v3028_v53, %v1070_v3  ;;  %v1569_v50 = vsub.f32 %v1441_v14, %v1505_v32  ;;  %v1443_v37 = vmax.f32 %v1229_v11, 0.0  ;;  %v1082_v13 = vpop.f32.mrf.mxu1 }
 0x171   : > { %1632 = vst [vmem:[%s2510_s14 + $0x158] sm:$0xff] %v1568_v1  ;;  %v1507_v59 = vmul.f32 %v1379_v54, %v1379_v54  ;;  %v1145_v44 = vadd.f32 %v913_v34, %v3029_v25  ;;  %v1442_v38 = vmax.f32 %v1228_v23, 0.0  ;;  %v1230_v33 = vadd.f32 %v2487_v61, %v1144_v43 }
 0x172   : > { %v1506_v2 = vmul.f32 %v1378_v21, %v1378_v21  ;;  %v1380_v39 = vadd.f32 %v2489_v16, %v1294_v20  ;;  %1633 = vst [vmem:[%s2510_s14 + $0x160] sm:$0xff] %v1569_v50  ;;  %v1295_v57 = vsub.f32 %v3029_v25, %v913_v34  ;;  %v1147_v62 = vadd.f32 %v1074_v58, %v3030_v56  ;;  %v3034_v21 = vld [vmem:[#allocation23_spill] sm:$0xff]  ;;  %v925_v20 = vpop.f32.mrf.mxu0 }
 0x173   : > { %v1571_v51 = vsub.f32 %v1443_v37, %v1507_v59  ;;  %v1231_v29 = vadd.f32 %v2470_v8, %v1145_v44  ;;  %v1444_v45 = vmax.f32 %v1230_v33, 0.0  ;;  %v1297_v10 = vsub.f32 %v3030_v56, %v1074_v58  ;;  %v3035_v59 = vld [vmem:[#allocation24_spill] sm:$0xff] }
 0x174   : > { %v1570_v26 = vsub.f32 %v1442_v38, %v1506_v2  ;;  %v1508_v18 = vmul.f32 %v1380_v39, %v1380_v39  ;;  %v1381_v3 = vadd.f32 %v2472_v7, %v1295_v57  ;;  %v1233_v30 = vadd.f32 %v2474_v6, %v1147_v62  ;;  %v1086_v39 = vpop.f32.mrf.mxu1  ;;  %v3036_v57 = vld [vmem:[#allocation25_spill] sm:$0xff] }
 0x175   : > { %1635 = vst [vmem:[%s2510_s14 + $0x170] sm:$0xff] %v1571_v51  ;;  %v1445_v19 = vmax.f32 %v1231_v29, 0.0  ;;  %v1146_v46 = vadd.f32 %v915_v49, %v3031_v22  ;;  %v1383_v40 = vadd.f32 %v2476_v4, %v1297_v10  ;;  %v1296_v31 = vsub.f32 %v3031_v22, %v915_v49 }
 0x176   : > { %1634 = vst [vmem:[%s2510_s14 + $0x168] sm:$0xff] %v1570_v26  ;;  %v1572_v60 = vsub.f32 %v1444_v45, %v1508_v18  ;;  %v1148_v34 = vadd.f32 %v1076_v24, %v3032_v47  ;;  %v1509_v35 = vmul.f32 %v1381_v3, %v1381_v3  ;;  %v1447_v52 = vmax.f32 %v1233_v30, 0.0  ;;  %v3037_v18 = vld [vmem:[#allocation26_spill] sm:$0xff]  ;;  %v927_v3 = vpop.f32.mrf.mxu0 }
 0x177   : > { %v1232_v0 = vadd.f32 %v2483_v63, %v1146_v46  ;;  %v1298_v36 = vsub.f32 %v3032_v47, %v1076_v24  ;;  %v1511_v17 = vmul.f32 %v1383_v40, %v1383_v40  ;;  %v1382_v55 = vadd.f32 %v2485_v15, %v1296_v31  ;;  %v3038_v31 = vld [vmem:[#allocation27_spill] sm:$0xff] }
 0x178   : > { %1636 = vst [vmem:[%s2510_s14 + $0x178] sm:$0xff] %v1572_v60  ;;  %v1234_v41 = vadd.f32 %v2487_v61, %v1148_v34  ;;  %v1149_v58 = vadd.f32 %v919_v12, %v3033_v48  ;;  %v1573_v9 = vsub.f32 %v1445_v19, %v1509_v35  ;;  %v1299_v42 = vsub.f32 %v3033_v48, %v919_v12  ;;  %v1088_v34 = vpop.f32.mrf.mxu1 }
 0x179   : > { %v1446_v14 = vmax.f32 %v1232_v0, 0.0  ;;  %v1384_v28 = vadd.f32 %v2489_v16, %v1298_v36  ;;  %v1575_v1 = vsub.f32 %v1447_v52, %v1511_v17  ;;  %v1510_v32 = vmul.f32 %v1382_v55, %v1382_v55 }
 0x17a   : > { %v1448_v11 = vmax.f32 %v1234_v41, 0.0  ;;  %v1235_v54 = vadd.f32 %v2470_v8, %v1149_v58  ;;  %1637 = vst [vmem:[%s2510_s14 + $0x180] sm:$0xff] %v1573_v9  ;;  %v1385_v23 = vadd.f32 %v2472_v7, %v1299_v42  ;;  %v1151_v53 = vadd.f32 %v1080_v5, %v3034_v21  ;;  %v3039_v41 = vld [vmem:[#allocation28_spill] sm:$0xff]  ;;  %v931_v58 = vpop.f32.mrf.mxu0  ;;  %v3040_v42 = vld [vmem:[#allocation29_spill] sm:$0xff] }
 0x17b   : > { %v1512_v49 = vmul.f32 %v1384_v28, %v1384_v28  ;;  %v1301_v43 = vsub.f32 %v3034_v21, %v1080_v5  ;;  %1639 = vst [vmem:[%s2510_s14 + $0x190] sm:$0xff] %v1575_v1  ;;  %v1574_v50 = vsub.f32 %v1446_v14, %v1510_v32  ;;  %v1150_v25 = vadd.f32 %v921_v27, %v3035_v59 }
 0x17c   : > { %v1449_v37 = vmax.f32 %v1235_v54, 0.0  ;;  %v1300_v44 = vsub.f32 %v3035_v59, %v921_v27  ;;  %v1513_v38 = vmul.f32 %v1385_v23, %v1385_v23  ;;  %v1237_v2 = vadd.f32 %v2474_v6, %v1151_v53 }
 0x17d   : > { %v1576_v24 = vsub.f32 %v1448_v11, %v1512_v49  ;;  %v1387_v33 = vadd.f32 %v2476_v4, %v1301_v43  ;;  %1638 = vst [vmem:[%s2510_s14 + $0x188] sm:$0xff] %v1574_v50  ;;  %v1236_v51 = vadd.f32 %v2483_v63, %v1150_v25  ;;  %v1152_v56 = vadd.f32 %v1082_v13, %v3036_v57  ;;  %v1092_v49 = vpop.f32.mrf.mxu1  ;;  %v3041_v43 = vld [vmem:[#allocation30_spill] sm:$0xff] }
 0x17e   : > { %v1386_v29 = vadd.f32 %v2485_v15, %v1300_v44  ;;  %v1302_v62 = vsub.f32 %v3036_v57, %v1082_v13  ;;  %v1577_v12 = vsub.f32 %v1449_v37, %v1513_v38  ;;  %v1451_v26 = vmax.f32 %v1237_v2, 0.0  ;;  %v933_v44 = vpop.f32.mrf.mxu0 }
 0x17f   : > { %1640 = vst [vmem:[%s2510_s14 + $0x198] sm:$0xff] %v1576_v24  ;;  %v1515_v45 = vmul.f32 %v1387_v33, %v1387_v33  ;;  %v1153_v10 = vadd.f32 %v925_v20, %v3037_v18  ;;  %v1450_v19 = vmax.f32 %v1236_v51, 0.0  ;;  %v1238_v22 = vadd.f32 %v2487_v61, %v1152_v56 }
 0x180   : > { %v1514_v30 = vmul.f32 %v1386_v29, %v1386_v29  ;;  %v1388_v46 = vadd.f32 %v2489_v16, %v1302_v62  ;;  %1641 = vst [vmem:[%s2510_s14 + $0x1a0] sm:$0xff] %v1577_v12  ;;  %v1303_v40 = vsub.f32 %v3037_v18, %v925_v20  ;;  %v1155_v47 = vadd.f32 %v1086_v39, %v3038_v31  ;;  %v3042_v29 = vld [vmem:[#allocation31_spill] sm:$0xff]  ;;  %v1094_v62 = vpop.f32.mrf.mxu1 }
 0x181   : > { %v1579_v5 = vsub.f32 %v1451_v26, %v1515_v45  ;;  %v1239_v60 = vadd.f32 %v2470_v8, %v1153_v10  ;;  %v1452_v52 = vmax.f32 %v1238_v22, 0.0  ;;  %v1305_v36 = vsub.f32 %v3038_v31, %v1086_v39  ;;  %v3043_v45 = vld [vmem:[#allocation32_spill] sm:$0xff] }
 0x182   : > { %v1578_v35 = vsub.f32 %v1450_v19, %v1514_v30  ;;  %v1516_v0 = vmul.f32 %v1388_v46, %v1388_v46  ;;  %v1389_v27 = vadd.f32 %v2472_v7, %v1303_v40  ;;  %v1241_v55 = vadd.f32 %v2474_v6, %v1155_v47  ;;  %v3044_v46 = vld [vmem:[#allocation33_spill] sm:$0xff] }
 0x183   : > { %1643 = vst [vmem:[%s2510_s14 + $0x1b0] sm:$0xff] %v1579_v5  ;;  %v1453_v17 = vmax.f32 %v1239_v60, 0.0  ;;  %v1154_v48 = vadd.f32 %v927_v3, %v3039_v41  ;;  %v1391_v14 = vadd.f32 %v2476_v4, %v1305_v36  ;;  %v1304_v28 = vsub.f32 %v3039_v41, %v927_v3 }
 0x184   : > { %1642 = vst [vmem:[%s2510_s14 + $0x1a8] sm:$0xff] %v1578_v35  ;;  %v1580_v9 = vsub.f32 %v1452_v52, %v1516_v0  ;;  %v1156_v13 = vadd.f32 %v1088_v34, %v3040_v42  ;;  %v1517_v1 = vmul.f32 %v1389_v27, %v1389_v27  ;;  %v1455_v32 = vmax.f32 %v1241_v55, 0.0 }
 0x185   : > { %v1240_v11 = vadd.f32 %v2483_v63, %v1154_v48  ;;  %v1306_v54 = vsub.f32 %v3040_v42, %v1088_v34  ;;  %v1519_v23 = vmul.f32 %v1391_v14, %v1391_v14  ;;  %v1390_v21 = vadd.f32 %v2485_v15, %v1304_v28 }
 0x186   : > { %1644 = vst [vmem:[%s2510_s14 + $0x1b8] sm:$0xff] %v1580_v9  ;;  %v1242_v53 = vadd.f32 %v2487_v61, %v1156_v13  ;;  %v1157_v20 = vadd.f32 %v931_v58, %v3041_v43  ;;  %v1581_v50 = vsub.f32 %v1453_v17, %v1517_v1  ;;  %v1307_v25 = vsub.f32 %v3041_v43, %v931_v58 }
 0x187   : > { %v1454_v37 = vmax.f32 %v1240_v11, 0.0  ;;  %v1392_v59 = vadd.f32 %v2489_v16, %v1306_v54  ;;  %v1583_v24 = vsub.f32 %v1455_v32, %v1519_v23  ;;  %v1518_v38 = vmul.f32 %v1390_v21, %v1390_v21 }
 0x188   : > { %v1456_v2 = vmax.f32 %v1242_v53, 0.0  ;;  %v1243_v33 = vadd.f32 %v2470_v8, %v1157_v20  ;;  %1645 = vst [vmem:[%s2510_s14 + $0x1c0] sm:$0xff] %v1581_v50  ;;  %v1393_v51 = vadd.f32 %v2472_v7, %v1307_v25  ;;  %v1159_v57 = vadd.f32 %v1092_v49, %v3042_v29 }
 0x189   : > { %v1520_v39 = vmul.f32 %v1392_v59, %v1392_v59  ;;  %v1309_v56 = vsub.f32 %v3042_v29, %v1092_v49  ;;  %1647 = vst [vmem:[%s2510_s14 + $0x1d0] sm:$0xff] %v1583_v24  ;;  %v1582_v12 = vsub.f32 %v1454_v37, %v1518_v38  ;;  %v1158_v18 = vadd.f32 %v933_v44, %v3043_v45 }
 0x18a   : > { %v1457_v26 = vmax.f32 %v1243_v33, 0.0  ;;  %v1308_v10 = vsub.f32 %v3043_v45, %v933_v44  ;;  %v1521_v8 = vmul.f32 %v1393_v51, %v1393_v51  ;;  %v1245_v19 = vadd.f32 %v2474_v6, %v1159_v57 }
 0x18b   : > { %v1584_v3 = vsub.f32 %v1456_v2, %v1520_v39  ;;  %v1395_v7 = vadd.f32 %v2476_v4, %v1309_v56  ;;  %1646 = vst [vmem:[%s2510_s14 + $0x1c8] sm:$0xff] %v1582_v12  ;;  %v1244_v30 = vadd.f32 %v2483_v63, %v1158_v18  ;;  %v1160_v5 = vadd.f32 %v1094_v62, %v3044_v46 }
 0x18c   : > { %v1394_v22 = vadd.f32 %v2485_v15, %v1308_v10  ;;  %v1310_v60 = vsub.f32 %v3044_v46, %v1094_v62  ;;  %v1585_v40 = vsub.f32 %v1457_v26, %v1521_v8  ;;  %v1459_v31 = vmax.f32 %v1245_v19, 0.0 }
 0x18d   : > { %1648 = vst [vmem:[%s2510_s14 + $0x1d8] sm:$0xff] %v1584_v3  ;;  %v1523_v47 = vmul.f32 %v1395_v7, %v1395_v7  ;;  %v1458_v6 = vmax.f32 %v1244_v30, 0.0  ;;  %v1246_v4 = vadd.f32 %v2487_v61, %v1160_v5 }
 0x18e   : > { %v1522_v34 = vmul.f32 %v1394_v22, %v1394_v22  ;;  %v1396_v63 = vadd.f32 %v2489_v16, %v1310_v60  ;;  %1649 = vst [vmem:[%s2510_s14 + $0x1e0] sm:$0xff] %v1585_v40 }
 0x18f   : > { %v1587_v15 = vsub.f32 %v1459_v31, %v1523_v47  ;;  %v1460_v52 = vmax.f32 %v1246_v4, 0.0 }
 0x190   : > { %v1586_v35 = vsub.f32 %v1458_v6, %v1522_v34  ;;  %v1524_v0 = vmul.f32 %v1396_v63, %v1396_v63 }
 0x191   : > { %1651 = vst [vmem:[%s2510_s14 + $0x1f0] sm:$0xff] %v1587_v15 }
 0x192   : > { %1650 = vst [vmem:[%s2510_s14 + $0x1e8] sm:$0xff] %v1586_v35  ;;  %v1588_v61 = vsub.f32 %v1460_v52, %v1524_v0 }
 0x194   : > { %1652 = vst [vmem:[%s2510_s14 + $0x1f8] sm:$0xff] %v1588_v61 }
 0x195   : > { %1878 = shalt.err (!%p1875_p3)
}
 0x196   : > { %s1879_s11 = scalar_lea.hbm %s2901_s26, 8192  ;;  %s1883_s12 = scalar_lea.hbm %s2955_s6, 32768 }
 0x197   : > { %p1880_p4 = scmp.ne.s32.totalorder %s2901_s26, %s1879_s11  ;;  %p1884_p9 = scmp.lt.s32.totalorder %s2901_s26, %s2955_s6 }
 0x198   : > { %p1885_p10 = scmp.lt.s32.totalorder %s1883_s12, %s1879_s11 }
 0x199   : > { %p1881_p7 = pnand %p1880_p4, %p2004_p5 }
 0x19a   : > { %p1886_p11 = por %p1885_p10, %p1884_p9 }
 0x19b   : > { %p1882_p8 = pneg %p1881_p7 }
 0x19d   : > { %p1887_p12 = pnand %p1886_p11, %p1882_p8 }
 0x19f   : > { %1890 = shalt.err (!%p1887_p12)
}
 0x1a0   : > { %s1929_s16 = smov 512   ;;  %s1930_s19 = smov 32  }
 0x1a1   : > { %1823 = dma.vmem_to_hbm [thread:$0]  (%p2004_p5), %s2903_s18, 8192, %s2901_s26, %s2909_s25, %s1929_s16, %s1929_s16, %s1930_s19  }
 0x1a2 PF: > { %p1829_p13 = scmp.ge.s32.totalorder %s1925_s24, 2  ;;  %s1683_s20 = sand.u32 1, %s1913_s21  }
 0x1a3   : > { %s1684_s28 = scalar_lea.sflag [#allocation3], %s1683_s20 }
 0x1a4   : > { %p1826_p0 = pnand %p1829_p13, %p2008_p6 }
 0x1a6   : > { %p1827_p1 = pneg %p1826_p0 }
 0x1a8   : > { %1908 = dma.done.wait (%p1827_p1), %s1684_s28, 8192  }
 0x1a9   : > { %1910 = vsyncadd (%p1827_p1), %s1684_s28, 4294959104  ;;  %p16_p2 = scmp.ge.s32.totalorder %s1991_s27, 6   ;;  %s3045_s21 = smov %s1917_s22 }
 0x1aa   : > { %s3046_s22 = smov %s1921_s23  ;;  %s3047_s23 = smov %s2002_s30 }
 0x1ab   : > { %s3048_s24 = smov %s1991_s27  ;;  %18 = sbr.rel (!%p16_p2) target bundleno = 3 (0x3), region = 82 }
 0x1b0   :  { %1689 = vsyncpa [#allocation3], 1 }
 0x1b1   :  { %1691 = vsyncpa [#allocation3 + $0x1], 1 }

</bundles_post_ra>
